<compile_context>
chip_gen: v5e
topology: v5e:2x2
jax: 0.10.0
libtpu: 0.0.40
codegen_flags: <defaults>
</compile_context>

<pallas_src>
import jax
import jax.numpy as jnp
from jax import lax
from jax.experimental import pallas as pl
from jax.experimental.pallas import tpu as pltpu
import numpy as np


def _lstm_kernel(x_ref, h0_ref, c0_ref, wih_ref, whh_ref, b_ref,
                 wfc_ref, bfc_ref,
                 y_ref, hn_ref, cn_ref,
                 gx_ref):
    Bp = hn_ref.shape[0]
    Hp = hn_ref.shape[-1]
    T = x_ref.shape[0] // Bp

    # One-shot input projection + folded bias for ALL timesteps.  This runs
    # off the recurrence's critical path and lands in VMEM scratch.
    gx_ref[...] = (jnp.dot(x_ref[...], wih_ref[...],
                           preferred_element_type=jnp.float32)
                   + b_ref[...])                                 # (T*Bp, 4*Hp)

    # Recurrent state stays register-resident across the unrolled time loop.
    h = h0_ref[...].astype(jnp.float32)      # (Bp, Hp)
    c = c0_ref[...].astype(jnp.float32)      # (Bp, Hp)

    # T is small and static -> fully unroll.  Each step: one (Bp,Hp)@(Hp,4Hp)
    # matmul (W_hh streamed from VMEM, not pinned in vregs), a sublane-aligned
    # slice of gx, one sigmoid, two tanh.
    for t in range(T):
        gates = (gx_ref[pl.ds(t * Bp, Bp), :]
                 + jnp.dot(h, whh_ref[...],
                           preferred_element_type=jnp.float32))  # (Bp, 4*Hp)
        # Gate layout (i, f, o, g): one sigmoid over 3 blocks, one tanh.
        sig = jax.nn.sigmoid(gates[:, :3 * Hp])
        g_g = jnp.tanh(gates[:, 3 * Hp:])
        i_g = sig[:, 0 * Hp:1 * Hp]
        f_g = sig[:, 1 * Hp:2 * Hp]
        o_g = sig[:, 2 * Hp:3 * Hp]
        c = f_g * c + i_g * g_g
        h = o_g * jnp.tanh(c)

    hn_ref[...] = h.astype(hn_ref.dtype)
    cn_ref[...] = c.astype(cn_ref.dtype)
    # FC head on the last hidden state (== out[:, -1, :] @ W_fc^T + b_fc);
    # output padded to 128 lanes so the store is an unmasked vst.
    y_ref[...] = (jnp.dot(h, wfc_ref[...], preferred_element_type=jnp.float32)
                  + bfc_ref[...]).astype(y_ref.dtype)


def _round_up(n, m):
    return -(-n // m) * m


def _pad_gate_blocks(w, H, Hp):
    """Pad a PyTorch-layout (4H, ...) LSTM param to (4Hp, ...) per gate block,
    reordering gate blocks from PyTorch (i, f, g, o) to kernel (i, f, o, g)."""
    parts = jnp.split(w, 4, axis=0)           # i, f, g, o
    pad = ((0, Hp - H),) + ((0, 0),) * (w.ndim - 1)
    order = (0, 1, 3, 2)                      # -> i, f, o, g
    return jnp.concatenate([jnp.pad(parts[k], pad) for k in order], axis=0)


def lstm_forecast_pallas(x, h0, c0, w_ih, w_hh, b_ih, b_hh, w_fc, b_fc):
    """x: (B, T, I) float32 (batch_first, like PyTorch).
    h0, c0: (num_layers=1, B, H).
    w_ih: (4H, I), w_hh: (4H, H), b_ih/b_hh: (4H,)   (PyTorch LSTM params)
    w_fc: (1, H), b_fc: (1,)                          (PyTorch Linear params)
    Returns (out (B,1), (h_n (1,B,H), c_n (1,B,H))).
    """
    B, T, I = x.shape
    H = w_hh.shape[1]
    Bp = _round_up(B, 8)        # sublane multiple
    Hp = _round_up(H, 128)      # lane multiple (gate blocks lane-aligned)
    Op = 128                    # FC output padded to one lane width

    # Time-major, batch-padded, flattened to (T*Bp, I): each timestep's rows
    # sit at a sublane-aligned static offset t*Bp inside the kernel.
    x_tm = jnp.transpose(x, (1, 0, 2))                               # (T, B, I)
    x_p = jnp.pad(x_tm, ((0, 0), (0, Bp - B), (0, 0))).reshape(T * Bp, I)

    h0_p = jnp.pad(h0[0], ((0, Bp - B), (0, Hp - H)))
    c0_p = jnp.pad(c0[0], ((0, Bp - B), (0, Hp - H)))

    # Weights laid out as lane-aligned gate blocks in (i, f, o, g) order.
    wih_t = jnp.transpose(_pad_gate_blocks(w_ih, H, Hp))                 # (I, 4Hp)
    whh_t = jnp.transpose(
        jnp.pad(_pad_gate_blocks(w_hh, H, Hp), ((0, 0), (0, Hp - H))))   # (Hp, 4Hp)
    b = _pad_gate_blocks(b_ih + b_hh, H, Hp).reshape(1, 4 * Hp)          # (1, 4Hp)
    wfc_t = jnp.pad(jnp.transpose(w_fc), ((0, Hp - H), (0, Op - 1)))     # (Hp, Op)
    bfc = jnp.pad(b_fc.reshape(1, 1), ((0, 0), (0, Op - 1)))             # (1, Op)

    full = lambda shp: pl.BlockSpec(shp, lambda i, _s=shp: (0,) * len(_s))

    y_p, hn_p, cn_p = pl.pallas_call(
        _lstm_kernel,
        out_shape=(
            jax.ShapeDtypeStruct((Bp, Op), x.dtype),
            jax.ShapeDtypeStruct((Bp, Hp), x.dtype),
            jax.ShapeDtypeStruct((Bp, Hp), x.dtype),
        ),
        grid_spec=pltpu.PrefetchScalarGridSpec(
            num_scalar_prefetch=0,
            grid=(1,),                      # single step: everything VMEM-resident
            in_specs=[
                full((T * Bp, I)),          # x (time-major, flattened)
                full((Bp, Hp)),             # h0
                full((Bp, Hp)),             # c0
                full((I, 4 * Hp)),          # W_ih^T (gate-block padded, i,f,o,g)
                full((Hp, 4 * Hp)),         # W_hh^T (gate-block padded, i,f,o,g)
                full((1, 4 * Hp)),          # b_ih + b_hh
                full((Hp, Op)),             # W_fc^T
                full((1, Op)),              # b_fc
            ],
            out_specs=[
                full((Bp, Op)),
                full((Bp, Hp)),
                full((Bp, Hp)),
            ],
            scratch_shapes=[
                pltpu.VMEM((T * Bp, 4 * Hp), jnp.float32),   # gx (input proj)
            ],
        ),
        compiler_params=pltpu.CompilerParams(
            dimension_semantics=("arbitrary",)),
    )(x_p, h0_p, c0_p, wih_t, whh_t, b, wfc_t, bfc)

    y = y_p[:B, :1]
    h_n = hn_p[:B, :H][None, :, :]
    c_n = cn_p[:B, :H][None, :, :]
    return y, (h_n, c_n)


def lstm_forecast_ref(x, h0, c0, w_ih, w_hh, b_ih, b_hh, w_fc, b_fc):
    """Pure-JAX reference matching PyTorch nn.LSTM + nn.Linear semantics."""
    wih_t = jnp.transpose(w_ih)
    whh_t = jnp.transpose(w_hh)
    b = b_ih + b_hh

    def step(carry, x_t):
        h, c = carry
        gates = x_t @ wih_t + h @ whh_t + b
        i, f, g, o = jnp.split(gates, 4, axis=-1)
        i = jax.nn.sigmoid(i); f = jax.nn.sigmoid(f)
        g = jnp.tanh(g); o = jax.nn.sigmoid(o)
        c = f * c + i * g
        h = o * jnp.tanh(c)
        return (h, c), None

    (h, c), _ = lax.scan(step, (h0[0], c0[0]), jnp.transpose(x, (1, 0, 2)))
    y = h @ jnp.transpose(w_fc) + b_fc
    return y, (h[None], c[None])


if __name__ == "__main__":
    # Small shapes consistent with the module: batch=2, seq=8, input_size=4, hidden=32.
    B, T, I, H = 2, 8, 4, 32
    key = jax.random.PRNGKey(0)
    ks = jax.random.split(key, 8)

    # PyTorch-style init: uniform(-1/sqrt(H), 1/sqrt(H)).
    k_lstm = 1.0 / np.sqrt(H)
    w_ih = jax.random.uniform(ks[0], (4 * H, I), jnp.float32, -k_lstm, k_lstm)
    w_hh = jax.random.uniform(ks[1], (4 * H, H), jnp.float32, -k_lstm, k_lstm)
    b_ih = jax.random.uniform(ks[2], (4 * H,), jnp.float32, -k_lstm, k_lstm)
    b_hh = jax.random.uniform(ks[3], (4 * H,), jnp.float32, -k_lstm, k_lstm)
    w_fc = jax.random.uniform(ks[4], (1, H), jnp.float32, -k_lstm, k_lstm)
    b_fc = jax.random.uniform(ks[5], (1,), jnp.float32, -k_lstm, k_lstm)

    x = jax.random.normal(ks[6], (B, T, I), jnp.float32)
    # init_hidden(batch_size): zeros of shape (num_layers, B, H)
    h0 = jnp.zeros((1, B, H), jnp.float32)
    c0 = jnp.zeros((1, B, H), jnp.float32)

    out, (h_n, c_n) = lstm_forecast_pallas(x, h0, c0, w_ih, w_hh, b_ih, b_hh,
                                           w_fc, b_fc)
    jax.block_until_ready((out, h_n, c_n))

    out_r, (h_r, c_r) = lstm_forecast_ref(x, h0, c0, w_ih, w_hh, b_ih, b_hh,
                                          w_fc, b_fc)
    np.testing.assert_allclose(np.asarray(out), np.asarray(out_r), rtol=1e-5, atol=1e-5)
    np.testing.assert_allclose(np.asarray(h_n), np.asarray(h_r), rtol=1e-5, atol=1e-5)
    np.testing.assert_allclose(np.asarray(c_n), np.asarray(c_r), rtol=1e-5, atol=1e-5)

    print("KERNEL_OK")
</pallas_src>

<mosaic_0001>
module attributes {stable_mosaic.version = 11 : i64} {
  func.func @_lstm_kernel(%arg0: i32, %arg1: memref<64x4xf32, #tpu.memory_space<vmem>>, %arg2: memref<8x128xf32, #tpu.memory_space<vmem>>, %arg3: memref<8x128xf32, #tpu.memory_space<vmem>>, %arg4: memref<4x512xf32, #tpu.memory_space<vmem>>, %arg5: memref<128x512xf32, #tpu.memory_space<vmem>>, %arg6: memref<1x512xf32, #tpu.memory_space<vmem>>, %arg7: memref<128x128xf32, #tpu.memory_space<vmem>>, %arg8: memref<1x128xf32, #tpu.memory_space<vmem>>, %arg9: memref<8x128xf32, #tpu.memory_space<vmem>>, %arg10: memref<8x128xf32, #tpu.memory_space<vmem>>, %arg11: memref<8x128xf32, #tpu.memory_space<vmem>>, %arg12: memref<64x512xf32, #tpu.memory_space<vmem>>) attributes {dimension_semantics = [#tpu.dimension_semantics<arbitrary>], iteration_bounds = array<i64: 1>, scalar_prefetch = 0 : i64, scratch_operands = 1 : i64, tpu.core_type = #tpu.core_type<tc>, window_params = [{pipeline_mode = #tpu.pipeline_mode<synchronous>, transform_indices = @transform_0, window_bounds = array<i64: 64, 4>}, {pipeline_mode = #tpu.pipeline_mode<synchronous>, transform_indices = @transform_1, window_bounds = array<i64: 8, 128>}, {pipeline_mode = #tpu.pipeline_mode<synchronous>, transform_indices = @transform_2, window_bounds = array<i64: 8, 128>}, {pipeline_mode = #tpu.pipeline_mode<synchronous>, transform_indices = @transform_3, window_bounds = array<i64: 4, 512>}, {pipeline_mode = #tpu.pipeline_mode<synchronous>, transform_indices = @transform_4, window_bounds = array<i64: 128, 512>}, {pipeline_mode = #tpu.pipeline_mode<synchronous>, transform_indices = @transform_5, window_bounds = array<i64: 1, 512>}, {pipeline_mode = #tpu.pipeline_mode<synchronous>, transform_indices = @transform_6, window_bounds = array<i64: 128, 128>}, {pipeline_mode = #tpu.pipeline_mode<synchronous>, transform_indices = @transform_7, window_bounds = array<i64: 1, 128>}, {pipeline_mode = #tpu.pipeline_mode<synchronous>, transform_indices = @transform_8, window_bounds = array<i64: 8, 128>}, {pipeline_mode = #tpu.pipeline_mode<synchronous>, transform_indices = @transform_9, window_bounds = array<i64: 8, 128>}, {pipeline_mode = #tpu.pipeline_mode<synchronous>, transform_indices = @transform_10, window_bounds = array<i64: 8, 128>}]} {
    %c0 = arith.constant 0 : index
    %c0_0 = arith.constant 0 : index
    %0 = vector.load %arg1[%c0, %c0_0] : memref<64x4xf32, #tpu.memory_space<vmem>>, vector<64x4xf32>
    %c0_1 = arith.constant 0 : index
    %c0_2 = arith.constant 0 : index
    %1 = vector.load %arg4[%c0_1, %c0_2] : memref<4x512xf32, #tpu.memory_space<vmem>>, vector<4x512xf32>
    %cst = arith.constant dense<0.000000e+00> : vector<64x512xf32>
    %2 = tpu.matmul %0, %1, %cst {dimension_numbers = #tpu.dot_dimension_numbers<[1], [0], [0], [1], [0, 0, 1, 1], [], []>} : vector<64x4xf32>, vector<4x512xf32>, vector<64x512xf32> -> vector<64x512xf32>
    %c0_3 = arith.constant 0 : index
    %c0_4 = arith.constant 0 : index
    %3 = vector.load %arg6[%c0_3, %c0_4] : memref<1x512xf32, #tpu.memory_space<vmem>>, vector<1x512xf32>
    %4 = vector.broadcast %3 : vector<1x512xf32> to vector<64x512xf32>
    %5 = arith.addf %2, %4 : vector<64x512xf32>
    %c0_5 = arith.constant 0 : index
    %c0_6 = arith.constant 0 : index
    %6 = vector.load %arg12[%c0_5, %c0_6] : memref<64x512xf32, #tpu.memory_space<vmem>>, vector<64x512xf32>
    tpu.vector_store %arg12[%c0_5, %c0_6], %5 {strides = array<i32>} : memref<64x512xf32, #tpu.memory_space<vmem>>, vector<64x512xf32>,
    %c0_7 = arith.constant 0 : index
    %c0_8 = arith.constant 0 : index
    %7 = vector.load %arg2[%c0_7, %c0_8] : memref<8x128xf32, #tpu.memory_space<vmem>>, vector<8x128xf32>
    %c0_9 = arith.constant 0 : index
    %c0_10 = arith.constant 0 : index
    %8 = vector.load %arg3[%c0_9, %c0_10] : memref<8x128xf32, #tpu.memory_space<vmem>>, vector<8x128xf32>
    %c0_11 = arith.constant 0 : index
    %c0_12 = arith.constant 0 : index
    %9 = vector.load %arg12[%c0_11, %c0_12] : memref<64x512xf32, #tpu.memory_space<vmem>>, vector<8x512xf32>
    %c0_13 = arith.constant 0 : index
    %c0_14 = arith.constant 0 : index
    %10 = vector.load %arg5[%c0_13, %c0_14] : memref<128x512xf32, #tpu.memory_space<vmem>>, vector<128x512xf32>
    %cst_15 = arith.constant dense<0.000000e+00> : vector<8x512xf32>
    %11 = tpu.matmul %7, %10, %cst_15 {dimension_numbers = #tpu.dot_dimension_numbers<[1], [0], [0], [1], [0, 0, 1, 1], [], []>} : vector<8x128xf32>, vector<128x512xf32>, vector<8x512xf32> -> vector<8x512xf32>
    %12 = arith.addf %9, %11 : vector<8x512xf32>
    %13 = vector.extract_strided_slice %12 {offsets = [0, 0], sizes = [8, 384], strides = [1, 1]} : vector<8x512xf32> to vector<8x384xf32>
    %14 = arith.negf %13 : vector<8x384xf32>
    %15 = math.exp %14 : vector<8x384xf32>
    %cst_16 = arith.constant 1.000000e+00 : f32
    %16 = vector.broadcast %cst_16 : f32 to vector<8x384xf32>
    %17 = arith.addf %16, %15 : vector<8x384xf32>
    %18 = arith.divf %16, %17 : vector<8x384xf32>
    %19 = vector.extract_strided_slice %12 {offsets = [0, 384], sizes = [8, 128], strides = [1, 1]} : vector<8x512xf32> to vector<8x128xf32>
    %20 = math.tanh %19 : vector<8x128xf32>
    %21 = vector.extract_strided_slice %18 {offsets = [0, 0], sizes = [8, 128], strides = [1, 1]} : vector<8x384xf32> to vector<8x128xf32>
    %22 = vector.extract_strided_slice %18 {offsets = [0, 128], sizes = [8, 128], strides = [1, 1]} : vector<8x384xf32> to vector<8x128xf32>
    %23 = vector.extract_strided_slice %18 {offsets = [0, 256], sizes = [8, 128], strides = [1, 1]} : vector<8x384xf32> to vector<8x128xf32>
    %24 = arith.mulf %22, %8 : vector<8x128xf32>
    %25 = arith.mulf %21, %20 : vector<8x128xf32>
    %26 = arith.addf %24, %25 : vector<8x128xf32>
    %27 = math.tanh %26 : vector<8x128xf32>
    %28 = arith.mulf %23, %27 : vector<8x128xf32>
    %c8 = arith.constant 8 : index
    %c0_17 = arith.constant 0 : index
    %29 = vector.load %arg12[%c8, %c0_17] : memref<64x512xf32, #tpu.memory_space<vmem>>, vector<8x512xf32>
    %c0_18 = arith.constant 0 : index
    %c0_19 = arith.constant 0 : index
    %30 = vector.load %arg5[%c0_18, %c0_19] : memref<128x512xf32, #tpu.memory_space<vmem>>, vector<128x512xf32>
    %cst_20 = arith.constant dense<0.000000e+00> : vector<8x512xf32>
    %31 = tpu.matmul %28, %30, %cst_20 {dimension_numbers = #tpu.dot_dimension_numbers<[1], [0], [0], [1], [0, 0, 1, 1], [], []>} : vector<8x128xf32>, vector<128x512xf32>, vector<8x512xf32> -> vector<8x512xf32>
    %32 = arith.addf %29, %31 : vector<8x512xf32>
    %33 = vector.extract_strided_slice %32 {offsets = [0, 0], sizes = [8, 384], strides = [1, 1]} : vector<8x512xf32> to vector<8x384xf32>
    %34 = arith.negf %33 : vector<8x384xf32>
    %35 = math.exp %34 : vector<8x384xf32>
    %cst_21 = arith.constant 1.000000e+00 : f32
    %36 = vector.broadcast %cst_21 : f32 to vector<8x384xf32>
    %37 = arith.addf %36, %35 : vector<8x384xf32>
    %38 = arith.divf %36, %37 : vector<8x384xf32>
    %39 = vector.extract_strided_slice %32 {offsets = [0, 384], sizes = [8, 128], strides = [1, 1]} : vector<8x512xf32> to vector<8x128xf32>
    %40 = math.tanh %39 : vector<8x128xf32>
    %41 = vector.extract_strided_slice %38 {offsets = [0, 0], sizes = [8, 128], strides = [1, 1]} : vector<8x384xf32> to vector<8x128xf32>
    %42 = vector.extract_strided_slice %38 {offsets = [0, 128], sizes = [8, 128], strides = [1, 1]} : vector<8x384xf32> to vector<8x128xf32>
    %43 = vector.extract_strided_slice %38 {offsets = [0, 256], sizes = [8, 128], strides = [1, 1]} : vector<8x384xf32> to vector<8x128xf32>
    %44 = arith.mulf %42, %26 : vector<8x128xf32>
    %45 = arith.mulf %41, %40 : vector<8x128xf32>
    %46 = arith.addf %44, %45 : vector<8x128xf32>
    %47 = math.tanh %46 : vector<8x128xf32>
    %48 = arith.mulf %43, %47 : vector<8x128xf32>
    %c16 = arith.constant 16 : index
    %c0_22 = arith.constant 0 : index
    %49 = vector.load %arg12[%c16, %c0_22] : memref<64x512xf32, #tpu.memory_space<vmem>>, vector<8x512xf32>
    %c0_23 = arith.constant 0 : index
    %c0_24 = arith.constant 0 : index
    %50 = vector.load %arg5[%c0_23, %c0_24] : memref<128x512xf32, #tpu.memory_space<vmem>>, vector<128x512xf32>
    %cst_25 = arith.constant dense<0.000000e+00> : vector<8x512xf32>
    %51 = tpu.matmul %48, %50, %cst_25 {dimension_numbers = #tpu.dot_dimension_numbers<[1], [0], [0], [1], [0, 0, 1, 1], [], []>} : vector<8x128xf32>, vector<128x512xf32>, vector<8x512xf32> -> vector<8x512xf32>
    %52 = arith.addf %49, %51 : vector<8x512xf32>
    %53 = vector.extract_strided_slice %52 {offsets = [0, 0], sizes = [8, 384], strides = [1, 1]} : vector<8x512xf32> to vector<8x384xf32>
    %54 = arith.negf %53 : vector<8x384xf32>
    %55 = math.exp %54 : vector<8x384xf32>
    %cst_26 = arith.constant 1.000000e+00 : f32
    %56 = vector.broadcast %cst_26 : f32 to vector<8x384xf32>
    %57 = arith.addf %56, %55 : vector<8x384xf32>
    %58 = arith.divf %56, %57 : vector<8x384xf32>
    %59 = vector.extract_strided_slice %52 {offsets = [0, 384], sizes = [8, 128], strides = [1, 1]} : vector<8x512xf32> to vector<8x128xf32>
    %60 = math.tanh %59 : vector<8x128xf32>
    %61 = vector.extract_strided_slice %58 {offsets = [0, 0], sizes = [8, 128], strides = [1, 1]} : vector<8x384xf32> to vector<8x128xf32>
    %62 = vector.extract_strided_slice %58 {offsets = [0, 128], sizes = [8, 128], strides = [1, 1]} : vector<8x384xf32> to vector<8x128xf32>
    %63 = vector.extract_strided_slice %58 {offsets = [0, 256], sizes = [8, 128], strides = [1, 1]} : vector<8x384xf32> to vector<8x128xf32>
    %64 = arith.mulf %62, %46 : vector<8x128xf32>
    %65 = arith.mulf %61, %60 : vector<8x128xf32>
    %66 = arith.addf %64, %65 : vector<8x128xf32>
    %67 = math.tanh %66 : vector<8x128xf32>
    %68 = arith.mulf %63, %67 : vector<8x128xf32>
    %c24 = arith.constant 24 : index
    %c0_27 = arith.constant 0 : index
    %69 = vector.load %arg12[%c24, %c0_27] : memref<64x512xf32, #tpu.memory_space<vmem>>, vector<8x512xf32>
    %c0_28 = arith.constant 0 : index
    %c0_29 = arith.constant 0 : index
    %70 = vector.load %arg5[%c0_28, %c0_29] : memref<128x512xf32, #tpu.memory_space<vmem>>, vector<128x512xf32>
    %cst_30 = arith.constant dense<0.000000e+00> : vector<8x512xf32>
    %71 = tpu.matmul %68, %70, %cst_30 {dimension_numbers = #tpu.dot_dimension_numbers<[1], [0], [0], [1], [0, 0, 1, 1], [], []>} : vector<8x128xf32>, vector<128x512xf32>, vector<8x512xf32> -> vector<8x512xf32>
    %72 = arith.addf %69, %71 : vector<8x512xf32>
    %73 = vector.extract_strided_slice %72 {offsets = [0, 0], sizes = [8, 384], strides = [1, 1]} : vector<8x512xf32> to vector<8x384xf32>
    %74 = arith.negf %73 : vector<8x384xf32>
    %75 = math.exp %74 : vector<8x384xf32>
    %cst_31 = arith.constant 1.000000e+00 : f32
    %76 = vector.broadcast %cst_31 : f32 to vector<8x384xf32>
    %77 = arith.addf %76, %75 : vector<8x384xf32>
    %78 = arith.divf %76, %77 : vector<8x384xf32>
    %79 = vector.extract_strided_slice %72 {offsets = [0, 384], sizes = [8, 128], strides = [1, 1]} : vector<8x512xf32> to vector<8x128xf32>
    %80 = math.tanh %79 : vector<8x128xf32>
    %81 = vector.extract_strided_slice %78 {offsets = [0, 0], sizes = [8, 128], strides = [1, 1]} : vector<8x384xf32> to vector<8x128xf32>
    %82 = vector.extract_strided_slice %78 {offsets = [0, 128], sizes = [8, 128], strides = [1, 1]} : vector<8x384xf32> to vector<8x128xf32>
    %83 = vector.extract_strided_slice %78 {offsets = [0, 256], sizes = [8, 128], strides = [1, 1]} : vector<8x384xf32> to vector<8x128xf32>
    %84 = arith.mulf %82, %66 : vector<8x128xf32>
    %85 = arith.mulf %81, %80 : vector<8x128xf32>
    %86 = arith.addf %84, %85 : vector<8x128xf32>
    %87 = math.tanh %86 : vector<8x128xf32>
    %88 = arith.mulf %83, %87 : vector<8x128xf32>
    %c32 = arith.constant 32 : index
    %c0_32 = arith.constant 0 : index
    %89 = vector.load %arg12[%c32, %c0_32] : memref<64x512xf32, #tpu.memory_space<vmem>>, vector<8x512xf32>
    %c0_33 = arith.constant 0 : index
    %c0_34 = arith.constant 0 : index
    %90 = vector.load %arg5[%c0_33, %c0_34] : memref<128x512xf32, #tpu.memory_space<vmem>>, vector<128x512xf32>
    %cst_35 = arith.constant dense<0.000000e+00> : vector<8x512xf32>
    %91 = tpu.matmul %88, %90, %cst_35 {dimension_numbers = #tpu.dot_dimension_numbers<[1], [0], [0], [1], [0, 0, 1, 1], [], []>} : vector<8x128xf32>, vector<128x512xf32>, vector<8x512xf32> -> vector<8x512xf32>
    %92 = arith.addf %89, %91 : vector<8x512xf32>
    %93 = vector.extract_strided_slice %92 {offsets = [0, 0], sizes = [8, 384], strides = [1, 1]} : vector<8x512xf32> to vector<8x384xf32>
    %94 = arith.negf %93 : vector<8x384xf32>
    %95 = math.exp %94 : vector<8x384xf32>
    %cst_36 = arith.constant 1.000000e+00 : f32
    %96 = vector.broadcast %cst_36 : f32 to vector<8x384xf32>
    %97 = arith.addf %96, %95 : vector<8x384xf32>
    %98 = arith.divf %96, %97 : vector<8x384xf32>
    %99 = vector.extract_strided_slice %92 {offsets = [0, 384], sizes = [8, 128], strides = [1, 1]} : vector<8x512xf32> to vector<8x128xf32>
    %100 = math.tanh %99 : vector<8x128xf32>
    %101 = vector.extract_strided_slice %98 {offsets = [0, 0], sizes = [8, 128], strides = [1, 1]} : vector<8x384xf32> to vector<8x128xf32>
    %102 = vector.extract_strided_slice %98 {offsets = [0, 128], sizes = [8, 128], strides = [1, 1]} : vector<8x384xf32> to vector<8x128xf32>
    %103 = vector.extract_strided_slice %98 {offsets = [0, 256], sizes = [8, 128], strides = [1, 1]} : vector<8x384xf32> to vector<8x128xf32>
    %104 = arith.mulf %102, %86 : vector<8x128xf32>
    %105 = arith.mulf %101, %100 : vector<8x128xf32>
    %106 = arith.addf %104, %105 : vector<8x128xf32>
    %107 = math.tanh %106 : vector<8x128xf32>
    %108 = arith.mulf %103, %107 : vector<8x128xf32>
    %c40 = arith.constant 40 : index
    %c0_37 = arith.constant 0 : index
    %109 = vector.load %arg12[%c40, %c0_37] : memref<64x512xf32, #tpu.memory_space<vmem>>, vector<8x512xf32>
    %c0_38 = arith.constant 0 : index
    %c0_39 = arith.constant 0 : index
    %110 = vector.load %arg5[%c0_38, %c0_39] : memref<128x512xf32, #tpu.memory_space<vmem>>, vector<128x512xf32>
    %cst_40 = arith.constant dense<0.000000e+00> : vector<8x512xf32>
    %111 = tpu.matmul %108, %110, %cst_40 {dimension_numbers = #tpu.dot_dimension_numbers<[1], [0], [0], [1], [0, 0, 1, 1], [], []>} : vector<8x128xf32>, vector<128x512xf32>, vector<8x512xf32> -> vector<8x512xf32>
    %112 = arith.addf %109, %111 : vector<8x512xf32>
    %113 = vector.extract_strided_slice %112 {offsets = [0, 0], sizes = [8, 384], strides = [1, 1]} : vector<8x512xf32> to vector<8x384xf32>
    %114 = arith.negf %113 : vector<8x384xf32>
    %115 = math.exp %114 : vector<8x384xf32>
    %cst_41 = arith.constant 1.000000e+00 : f32
    %116 = vector.broadcast %cst_41 : f32 to vector<8x384xf32>
    %117 = arith.addf %116, %115 : vector<8x384xf32>
    %118 = arith.divf %116, %117 : vector<8x384xf32>
    %119 = vector.extract_strided_slice %112 {offsets = [0, 384], sizes = [8, 128], strides = [1, 1]} : vector<8x512xf32> to vector<8x128xf32>
    %120 = math.tanh %119 : vector<8x128xf32>
    %121 = vector.extract_strided_slice %118 {offsets = [0, 0], sizes = [8, 128], strides = [1, 1]} : vector<8x384xf32> to vector<8x128xf32>
    %122 = vector.extract_strided_slice %118 {offsets = [0, 128], sizes = [8, 128], strides = [1, 1]} : vector<8x384xf32> to vector<8x128xf32>
    %123 = vector.extract_strided_slice %118 {offsets = [0, 256], sizes = [8, 128], strides = [1, 1]} : vector<8x384xf32> to vector<8x128xf32>
    %124 = arith.mulf %122, %106 : vector<8x128xf32>
    %125 = arith.mulf %121, %120 : vector<8x128xf32>
    %126 = arith.addf %124, %125 : vector<8x128xf32>
    %127 = math.tanh %126 : vector<8x128xf32>
    %128 = arith.mulf %123, %127 : vector<8x128xf32>
    %c48 = arith.constant 48 : index
    %c0_42 = arith.constant 0 : index
    %129 = vector.load %arg12[%c48, %c0_42] : memref<64x512xf32, #tpu.memory_space<vmem>>, vector<8x512xf32>
    %c0_43 = arith.constant 0 : index
    %c0_44 = arith.constant 0 : index
    %130 = vector.load %arg5[%c0_43, %c0_44] : memref<128x512xf32, #tpu.memory_space<vmem>>, vector<128x512xf32>
    %cst_45 = arith.constant dense<0.000000e+00> : vector<8x512xf32>
    %131 = tpu.matmul %128, %130, %cst_45 {dimension_numbers = #tpu.dot_dimension_numbers<[1], [0], [0], [1], [0, 0, 1, 1], [], []>} : vector<8x128xf32>, vector<128x512xf32>, vector<8x512xf32> -> vector<8x512xf32>
    %132 = arith.addf %129, %131 : vector<8x512xf32>
    %133 = vector.extract_strided_slice %132 {offsets = [0, 0], sizes = [8, 384], strides = [1, 1]} : vector<8x512xf32> to vector<8x384xf32>
    %134 = arith.negf %133 : vector<8x384xf32>
    %135 = math.exp %134 : vector<8x384xf32>
    %cst_46 = arith.constant 1.000000e+00 : f32
    %136 = vector.broadcast %cst_46 : f32 to vector<8x384xf32>
    %137 = arith.addf %136, %135 : vector<8x384xf32>
    %138 = arith.divf %136, %137 : vector<8x384xf32>
    %139 = vector.extract_strided_slice %132 {offsets = [0, 384], sizes = [8, 128], strides = [1, 1]} : vector<8x512xf32> to vector<8x128xf32>
    %140 = math.tanh %139 : vector<8x128xf32>
    %141 = vector.extract_strided_slice %138 {offsets = [0, 0], sizes = [8, 128], strides = [1, 1]} : vector<8x384xf32> to vector<8x128xf32>
    %142 = vector.extract_strided_slice %138 {offsets = [0, 128], sizes = [8, 128], strides = [1, 1]} : vector<8x384xf32> to vector<8x128xf32>
    %143 = vector.extract_strided_slice %138 {offsets = [0, 256], sizes = [8, 128], strides = [1, 1]} : vector<8x384xf32> to vector<8x128xf32>
    %144 = arith.mulf %142, %126 : vector<8x128xf32>
    %145 = arith.mulf %141, %140 : vector<8x128xf32>
    %146 = arith.addf %144, %145 : vector<8x128xf32>
    %147 = math.tanh %146 : vector<8x128xf32>
    %148 = arith.mulf %143, %147 : vector<8x128xf32>
    %c56 = arith.constant 56 : index
    %c0_47 = arith.constant 0 : index
    %149 = vector.load %arg12[%c56, %c0_47] : memref<64x512xf32, #tpu.memory_space<vmem>>, vector<8x512xf32>
    %c0_48 = arith.constant 0 : index
    %c0_49 = arith.constant 0 : index
    %150 = vector.load %arg5[%c0_48, %c0_49] : memref<128x512xf32, #tpu.memory_space<vmem>>, vector<128x512xf32>
    %cst_50 = arith.constant dense<0.000000e+00> : vector<8x512xf32>
    %151 = tpu.matmul %148, %150, %cst_50 {dimension_numbers = #tpu.dot_dimension_numbers<[1], [0], [0], [1], [0, 0, 1, 1], [], []>} : vector<8x128xf32>, vector<128x512xf32>, vector<8x512xf32> -> vector<8x512xf32>
    %152 = arith.addf %149, %151 : vector<8x512xf32>
    %153 = vector.extract_strided_slice %152 {offsets = [0, 0], sizes = [8, 384], strides = [1, 1]} : vector<8x512xf32> to vector<8x384xf32>
    %154 = arith.negf %153 : vector<8x384xf32>
    %155 = math.exp %154 : vector<8x384xf32>
    %cst_51 = arith.constant 1.000000e+00 : f32
    %156 = vector.broadcast %cst_51 : f32 to vector<8x384xf32>
    %157 = arith.addf %156, %155 : vector<8x384xf32>
    %158 = arith.divf %156, %157 : vector<8x384xf32>
    %159 = vector.extract_strided_slice %152 {offsets = [0, 384], sizes = [8, 128], strides = [1, 1]} : vector<8x512xf32> to vector<8x128xf32>
    %160 = math.tanh %159 : vector<8x128xf32>
    %161 = vector.extract_strided_slice %158 {offsets = [0, 0], sizes = [8, 128], strides = [1, 1]} : vector<8x384xf32> to vector<8x128xf32>
    %162 = vector.extract_strided_slice %158 {offsets = [0, 128], sizes = [8, 128], strides = [1, 1]} : vector<8x384xf32> to vector<8x128xf32>
    %163 = vector.extract_strided_slice %158 {offsets = [0, 256], sizes = [8, 128], strides = [1, 1]} : vector<8x384xf32> to vector<8x128xf32>
    %164 = arith.mulf %162, %146 : vector<8x128xf32>
    %165 = arith.mulf %161, %160 : vector<8x128xf32>
    %166 = arith.addf %164, %165 : vector<8x128xf32>
    %167 = math.tanh %166 : vector<8x128xf32>
    %168 = arith.mulf %163, %167 : vector<8x128xf32>
    %c0_52 = arith.constant 0 : index
    %c0_53 = arith.constant 0 : index
    %169 = vector.load %arg10[%c0_52, %c0_53] : memref<8x128xf32, #tpu.memory_space<vmem>>, vector<8x128xf32>
    tpu.vector_store %arg10[%c0_52, %c0_53], %168 {strides = array<i32>} : memref<8x128xf32, #tpu.memory_space<vmem>>, vector<8x128xf32>,
    %c0_54 = arith.constant 0 : index
    %c0_55 = arith.constant 0 : index
    %170 = vector.load %arg11[%c0_54, %c0_55] : memref<8x128xf32, #tpu.memory_space<vmem>>, vector<8x128xf32>
    tpu.vector_store %arg11[%c0_54, %c0_55], %166 {strides = array<i32>} : memref<8x128xf32, #tpu.memory_space<vmem>>, vector<8x128xf32>,
    %c0_56 = arith.constant 0 : index
    %c0_57 = arith.constant 0 : index
    %171 = vector.load %arg7[%c0_56, %c0_57] : memref<128x128xf32, #tpu.memory_space<vmem>>, vector<128x128xf32>
    %cst_58 = arith.constant dense<0.000000e+00> : vector<8x128xf32>
    %172 = tpu.matmul %168, %171, %cst_58 {dimension_numbers = #tpu.dot_dimension_numbers<[1], [0], [0], [1], [0, 0, 1, 1], [], []>} : vector<8x128xf32>, vector<128x128xf32>, vector<8x128xf32> -> vector<8x128xf32>
    %c0_59 = arith.constant 0 : index
    %c0_60 = arith.constant 0 : index
    %173 = vector.load %arg8[%c0_59, %c0_60] : memref<1x128xf32, #tpu.memory_space<vmem>>, vector<1x128xf32>
    %174 = vector.broadcast %173 : vector<1x128xf32> to vector<8x128xf32>
    %175 = arith.addf %172, %174 : vector<8x128xf32>
    %c0_61 = arith.constant 0 : index
    %c0_62 = arith.constant 0 : index
    %176 = vector.load %arg9[%c0_61, %c0_62] : memref<8x128xf32, #tpu.memory_space<vmem>>, vector<8x128xf32>
    tpu.vector_store %arg9[%c0_61, %c0_62], %175 {strides = array<i32>} : memref<8x128xf32, #tpu.memory_space<vmem>>, vector<8x128xf32>,
    return
  }
  func.func @transform_0(%arg0: i32) -> (i32, i32) {
    %c0_i32 = arith.constant 0 : i32
    %c0_i32_0 = arith.constant 0 : i32
    %c0_i32_1 = arith.constant 0 : i32
    return %c0_i32, %c0_i32_0 : i32, i32
  }
  func.func @transform_1(%arg0: i32) -> (i32, i32) {
    %c0_i32 = arith.constant 0 : i32
    %c0_i32_0 = arith.constant 0 : i32
    %c0_i32_1 = arith.constant 0 : i32
    return %c0_i32, %c0_i32_0 : i32, i32
  }
  func.func @transform_2(%arg0: i32) -> (i32, i32) {
    %c0_i32 = arith.constant 0 : i32
    %c0_i32_0 = arith.constant 0 : i32
    %c0_i32_1 = arith.constant 0 : i32
    return %c0_i32, %c0_i32_0 : i32, i32
  }
  func.func @transform_3(%arg0: i32) -> (i32, i32) {
    %c0_i32 = arith.constant 0 : i32
    %c0_i32_0 = arith.constant 0 : i32
    %c0_i32_1 = arith.constant 0 : i32
    return %c0_i32, %c0_i32_0 : i32, i32
  }
  func.func @transform_4(%arg0: i32) -> (i32, i32) {
    %c0_i32 = arith.constant 0 : i32
    %c0_i32_0 = arith.constant 0 : i32
    %c0_i32_1 = arith.constant 0 : i32
    return %c0_i32, %c0_i32_0 : i32, i32
  }
  func.func @transform_5(%arg0: i32) -> (i32, i32) {
    %c0_i32 = arith.constant 0 : i32
    %c0_i32_0 = arith.constant 0 : i32
    %c0_i32_1 = arith.constant 0 : i32
    return %c0_i32, %c0_i32_0 : i32, i32
  }
  func.func @transform_6(%arg0: i32) -> (i32, i32) {
    %c0_i32 = arith.constant 0 : i32
    %c0_i32_0 = arith.constant 0 : i32
    %c0_i32_1 = arith.constant 0 : i32
    return %c0_i32, %c0_i32_0 : i32, i32
  }
  func.func @transform_7(%arg0: i32) -> (i32, i32) {
    %c0_i32 = arith.constant 0 : i32
    %c0_i32_0 = arith.constant 0 : i32
    %c0_i32_1 = arith.constant 0 : i32
    return %c0_i32, %c0_i32_0 : i32, i32
  }
  func.func @transform_8(%arg0: i32) -> (i32, i32) {
    %c0_i32 = arith.constant 0 : i32
    %c0_i32_0 = arith.constant 0 : i32
    %c0_i32_1 = arith.constant 0 : i32
    return %c0_i32, %c0_i32_0 : i32, i32
  }
  func.func @transform_9(%arg0: i32) -> (i32, i32) {
    %c0_i32 = arith.constant 0 : i32
    %c0_i32_0 = arith.constant 0 : i32
    %c0_i32_1 = arith.constant 0 : i32
    return %c0_i32, %c0_i32_0 : i32, i32
  }
  func.func @transform_10(%arg0: i32) -> (i32, i32) {
    %c0_i32 = arith.constant 0 : i32
    %c0_i32_0 = arith.constant 0 : i32
    %c0_i32_1 = arith.constant 0 : i32
    return %c0_i32, %c0_i32_0 : i32, i32
  }
}

</mosaic_0001>

<bundles_post_ra>
// kernel: tpu_custom_call.1
= control target key start
LH: loop header
LB: loop body
LE: loop exit
PB: predicated region body
PF: predicated region fallthrough
CT: control target
= control target key end

     0   :  { %16 = vsyncpa [#allocation4], 0  ;;  %s3170_s0 = inlined_call_operand.vmem [shape: f32[64,4], index: 0, kind: input, shape index: {}]   ;;  %s3171_s1 = inlined_call_operand.vmem [shape: f32[8,128], index: 1, kind: input, shape index: {}]   ;;  %s3172_s2 = inlined_call_operand.vmem [shape: f32[8,128], index: 2, kind: input, shape index: {}]   ;;  %s3173_s3 = inlined_call_operand.vmem [shape: f32[4,512], index: 3, kind: input, shape index: {}]   ;;  %s3174_s4 = inlined_call_operand.hbm [shape: f32[128,512], index: 4, kind: input, shape index: {}]   ;;  %s3175_s5 = inlined_call_operand.vmem [shape: f32[1,512], index: 5, kind: input, shape index: {}]   ;;  %s3176_s6 = inlined_call_operand.hbm [shape: f32[128,128], index: 6, kind: input, shape index: {}]   ;;  %s3177_s7 = inlined_call_operand.vmem [shape: f32[1,128], index: 7, kind: input, shape index: {}]   ;;  %s3178_s8 = inlined_call_operand.hbm [shape: f32[8,128], index: 8, kind: output, shape index: {0}]   ;;  %s3179_s9 = inlined_call_operand.hbm [shape: f32[8,128], index: 9, kind: output, shape index: {1}]   ;;  %s3180_s10 = inlined_call_operand.hbm [shape: f32[8,128], index: 10, kind: output, shape index: {2}]  }
   0x1   :  { %17 = vsyncpa [#allocation7], 0 }
   0x2   :  { %18 = vsyncpa [#allocation5], 0 }
   0x3   :  { %19 = vsyncpa [#allocation10], 0  ;;  %s32_s15 = sshll.u32 %s3174_s4, 4  ;;  %s2084_s16 = smov [#allocation3]   ;;  %s33_s15 = int_to_ptr.hbm [resolvable:$true] %s32_s15 }
   0x4   :  { %s34_s17 = sshll.u32 %s2084_s16, 4  ;;  %s47_s20 = sshll.u32 %s3176_s6, 4  ;;  %s35_s17 = int_to_ptr.vmem [resolvable:$true] %s34_s17  ;;  %s48_s20 = int_to_ptr.hbm [resolvable:$true] %s47_s20 }
   0x5   :  { %s2085_s21 = smov 512   ;;  %s2086_s22 = smov 32  }
   0x6   :  { %40 = dma.hbm_to_vmem [thread:$0]  %s33_s15, 8192, %s35_s17, [#allocation4], %s2085_s21, %s2085_s21, %s2086_s22  }
   0x7   :  { %s2087_s23 = smov [#allocation6]   ;;  %s2088_s25 = smov 128  }
   0x8   :  { %s49_s24 = sshll.u32 %s2087_s23, 4  ;;  %s2089_s26 = smov 8   ;;  %s50_s24 = int_to_ptr.vmem [resolvable:$true] %s49_s24 }
   0x9   :  { %55 = dma.hbm_to_vmem [thread:$0]  %s48_s20, 2048, %s50_s24, [#allocation7], %s2088_s25, %s2088_s25, %s2089_s26  }
   0xa   :  { %2076 = dma.done.wait [#allocation4], 8192  }
   0xb   :  { %2077 = vsyncadd [#allocation4], 4294959104 }
   0xc   :  { %2078 = dma.done.wait [#allocation7], 2048  }
   0xd   :  { %2079 = vsyncadd [#allocation7], 4294965248  ;;  %v74_v0 = vld [vmem:[%s3173_s3] sm:$0xff]  ;;  %v75_v1 = vld [vmem:[%s3173_s3 + $0x8] sm:$0xff]  ;;  %vm120_vm0 = vcmask 1043456   ;;  %vm95_vm1 = vcmask 31744  }
   0xe   :  { %88 = vst [vmem:[#allocation1] ss:$2 sm:$0xff] %v74_v0  ;;  %v66_v3 = vld [vmem:[%s3170_s0] sm:$0xff]  ;;  %v2166_v4 = vld [vmem:[%s3170_s0 + $0x28] sm:$0xff]  ;;  %v2173_v5 = vld [vmem:[%s3170_s0 + $0x30] sm:$0xff]  ;;  %s1660_s28 = sshll.u32 %s3179_s9, 4  ;;  %s1661_s28 = int_to_ptr.hbm [resolvable:$true] %s1660_s28 }
   0xf   :  { %90 = vst [vmem:[#allocation1 + $0x10] ss:$2 sm:$0xff] %v75_v1  ;;  %v2178_v6 = vld [vmem:[%s3170_s0 + $0x38] sm:$0xff]  ;;  %v2185_v10 = vld [vmem:[#allocation3 + $0x1e8] sm:$0xff]  ;;  %v2191_v11 = vld [vmem:[#allocation3 + $0x1e0] sm:$0xff]  ;;  %s2091_s29 = smov [#allocation11]  }
  0x10   :  { %v2193_v12 = vld [vmem:[#allocation3 + $0x1f0] sm:$0xff]  ;;  %v2197_v13 = vld [vmem:[#allocation3 + $0x1c8] sm:$0xff]  ;;  %v2199_v14 = vld [vmem:[#allocation3 + $0x1f8] sm:$0xff]  ;;  %s1669_s30 = sshll.u32 %s2091_s29, 4  ;;  %s1671_s13 = sshll.u32 %s3180_s10, 4  ;;  %s1670_s30 = int_to_ptr.vmem [resolvable:$true] %s1669_s30  ;;  %s1672_s13 = int_to_ptr.hbm [resolvable:$true] %s1671_s13 }
  0x11   :  { %v2203_v15 = vld [vmem:[#allocation3 + $0x1c0] sm:$0xff]  ;;  %v2205_v16 = vld [vmem:[#allocation3 + $0x1d0] sm:$0xff]  ;;  %v2209_v17 = vld [vmem:[#allocation3 + $0x1a8] sm:$0xff]  ;;  %s2092_s15 = smov [#allocation8]   ;;  %s1649_s18 = sshll.u32 %s3178_s8, 4  ;;  %s1650_s18 = int_to_ptr.hbm [resolvable:$true] %s1649_s18 }
  0x12   :  { %v2211_v18 = vld [vmem:[#allocation3 + $0x1d8] sm:$0xff]  ;;  %v67_v19 = vld [vmem:[%s3170_s0 + $0x8] sm:$0xff]  ;;  %v2223_v21 = vld [vmem:[#allocation3 + $0x188] sm:$0xff]  ;;  %s1647_s9 = sshll.u32 %s2092_s15, 4  ;;  %s1648_s9 = int_to_ptr.vmem [resolvable:$true] %s1647_s9 }
  0x13   :  { %v2220_v20 = vld [vmem:[#allocation3 + $0x1a0] sm:$0xff]  ;;  %v2228_v22 = vld [vmem:[#allocation3 + $0x1b0] sm:$0xff]  ;;  %v2230_v23 = vld [vmem:[#allocation3 + $0x1b8] sm:$0xff] }
  0x14   :  { %v2234_v24 = vld [vmem:[#allocation3 + $0x180] sm:$0xff]  ;;  %v2236_v25 = vld [vmem:[#allocation3 + $0x168] sm:$0xff]  ;;  %v2240_v26 = vld [vmem:[#allocation3 + $0x190] sm:$0xff] }
  0x15   :  { %v91_v2 = vld.sshfl [vmem:[#allocation1] sm:$0xff pattern:$0x75316420]  ;;  %v92_v7 = vld.sshfl [vmem:[#allocation1 + $0x8] sm:$0xff pattern:$0x75316420] }
  0x16   :  { %1691 = vmatpush.msk.msra.mxu0 %vm120_vm0, %v91_v2  ;;  %1751 = vmatpush.msk.msra.mxu1 %vm120_vm0, %v91_v2  ;;  %v93_v8 = vld.sshfl [vmem:[#allocation1 + $0x10] sm:$0xff pattern:$0x75316420]  ;;  %v94_v9 = vld.sshfl [vmem:[#allocation1 + $0x18] sm:$0xff pattern:$0x75316420] }
  0x17   :  { %1752 = vmatpush.msk.msra.mxu2 %vm120_vm0, %v91_v2  ;;  %1753 = vmatpush.msk.msra.mxu3 %vm120_vm0, %v91_v2  ;;  %v2242_v27 = vld [vmem:[#allocation3 + $0x198] sm:$0xff]  ;;  %v2244_v28 = vld [vmem:[#allocation3 + $0x160] sm:$0xff]  ;;  %v2247_v29 = vld [vmem:[#allocation3 + $0x148] sm:$0xff] }
  0x18   :  { %1692 = vmatmul.msk.f32.vlgmr.msra.gmra.mxu0 %vm95_vm1, %v66_v3  ;;  %1697 = vmatmul.msk.f32.vlgmr.msra.gmra.mxu1 %vm95_vm1, %v2166_v4  ;;  %v2252_v30 = vld [vmem:[#allocation3 + $0x170] sm:$0xff]  ;;  %v2254_v31 = vld [vmem:[#allocation3 + $0x178] sm:$0xff]  ;;  %v68_v32 = vld [vmem:[%s3170_s0 + $0x10] sm:$0xff] }
  0x19   :  { %1698 = vmatmul.msk.f32.vlgmr.msra.gmra.mxu2 %vm95_vm1, %v2173_v5  ;;  %1699 = vmatmul.msk.f32.vlgmr.msra.gmra.mxu3 %vm95_vm1, %v2178_v6  ;;  %v2263_v33 = vld [vmem:[#allocation3 + $0x140] sm:$0xff]  ;;  %v2266_v34 = vld [vmem:[#allocation3 + $0x128] sm:$0xff]  ;;  %v2271_v35 = vld [vmem:[#allocation3 + $0x150] sm:$0xff] }
  0x1a   :  { %1700 = vmatpush.msk.msrb.mxu1 %vm120_vm0, %v92_v7  ;;  %1709 = vmatpush.msk.msrb.mxu2 %vm120_vm0, %v93_v8  ;;  %v2273_v36 = vld [vmem:[#allocation3 + $0x158] sm:$0xff]  ;;  %v2277_v37 = vld [vmem:[#allocation3 + $0x120] sm:$0xff]  ;;  %v2279_v38 = vld [vmem:[#allocation3 + $0x108] sm:$0xff] }
  0x1b   :  { %1718 = vmatpush.msk.msrb.mxu3 %vm120_vm0, %v94_v9  ;;  %395 = vmatpush.msrb.mxu0 %v2191_v11  ;;  %v2283_v39 = vld [vmem:[#allocation3 + $0x130] sm:$0xff]  ;;  %v2285_v40 = vld [vmem:[#allocation3 + $0x138] sm:$0xff]  ;;  %v2287_v41 = vld [vmem:[#allocation3 + $0x100] sm:$0xff] }
  0x1c   :  { %415 = vmatpush.msra.mxu1 %v2185_v10  ;;  %435 = vmatpush.msra.mxu2 %v2193_v12  ;;  %v2290_v42 = vld [vmem:[#allocation3 + $0xe8] sm:$0xff]  ;;  %v2295_v43 = vld [vmem:[#allocation3 + $0x110] sm:$0xff]  ;;  %v2297_v44 = vld [vmem:[#allocation3 + $0x118] sm:$0xff] }
  0x1d   :  { %455 = vmatpush.msra.mxu3 %v2199_v14  ;;  %396 = vmatpush.msrb.mxu0 %v2203_v15  ;;  %v69_v45 = vld [vmem:[%s3170_s0 + $0x18] sm:$0xff]  ;;  %v2306_v46 = vld [vmem:[#allocation3 + $0xe0] sm:$0xff]  ;;  %v2309_v47 = vld [vmem:[#allocation3 + $0xc8] sm:$0xff] }
  0x1e   :  { %416 = vmatpush.msra.mxu1 %v2197_v13  ;;  %436 = vmatpush.msra.mxu2 %v2205_v16  ;;  %v2314_v48 = vld [vmem:[#allocation3 + $0xf0] sm:$0xff]  ;;  %v2316_v49 = vld [vmem:[#allocation3 + $0xf8] sm:$0xff]  ;;  %v2320_v50 = vld [vmem:[#allocation3 + $0xc0] sm:$0xff] }
  0x1f   :  { %456 = vmatpush.msra.mxu3 %v2211_v18  ;;  %397 = vmatpush.msrb.mxu0 %v2220_v20  ;;  %v2322_v51 = vld [vmem:[#allocation3 + $0xa8] sm:$0xff]  ;;  %v2326_v52 = vld [vmem:[#allocation3 + $0xd0] sm:$0xff]  ;;  %v2328_v53 = vld [vmem:[#allocation3 + $0xd8] sm:$0xff] }
  0x20   :  { %417 = vmatpush.msra.mxu1 %v2209_v17  ;;  %1693 = vmatmul.msk.f32.gmra.mxu0 %vm95_vm1, %v67_v19  ;;  %3274 = vst [vmem:[#allocation16_spill] sm:$0xff] %v2322_v51  ;;  %v2330_v54 = vld [vmem:[#allocation3 + $0xa0] sm:$0xff]  ;;  %v2333_v55 = vld [vmem:[#allocation3 + $0x88] sm:$0xff]  ;;  %v2338_v56 = vld [vmem:[#allocation3 + $0xb0] sm:$0xff] }
  0x21   :  { %1701 = vmatmul.msk.f32.vlgmr.msrb.gmra.mxu1 %vm95_vm1, %v66_v3  ;;  %1710 = vmatmul.msk.f32.vlgmr.msrb.gmra.mxu2 %vm95_vm1, %v66_v3  ;;  %3275 = vst [vmem:[#allocation17_spill] sm:$0xff] %v2330_v54  ;;  %v2340_v57 = vld [vmem:[#allocation3 + $0xb8] sm:$0xff]  ;;  %v2342_v58 = vld [vmem:[#allocation3 + $0x80] sm:$0xff]  ;;  %v2357_v61 = vld [vmem:[#allocation3 + $0x68] sm:$0xff] }
  0x22   :  { %1719 = vmatmul.msk.f32.vlgmr.msrb.gmra.mxu3 %vm95_vm1, %v66_v3  ;;  %418 = vmatpush.msra.mxu1 %v2223_v21  ;;  %3276 = vst [vmem:[#allocation18_spill] sm:$0xff] %v2333_v55  ;;  %v70_v59 = vld [vmem:[%s3170_s0 + $0x20] sm:$0xff]  ;;  %v2351_v60 = vld [vmem:[#allocation3 + $0x60] sm:$0xff]  ;;  %v2359_v62 = vld [vmem:[#allocation3 + $0x90] sm:$0xff] }
  0x23   :  { %437 = vmatpush.msra.mxu2 %v2228_v22  ;;  %457 = vmatpush.msra.mxu3 %v2230_v23  ;;  %3277 = vst [vmem:[#allocation19_spill] sm:$0xff] %v2338_v56  ;;  %v2363_v63 = vld [vmem:[#allocation3 + $0x40] sm:$0xff]  ;;  %v2365_v0 = vld [vmem:[#allocation3 + $0x98] sm:$0xff]  ;;  %v2369_v1 = vld [vmem:[#allocation3 + $0x48] sm:$0xff] }
  0x24   :  { %398 = vmatpush.msrb.mxu0 %v2234_v24  ;;  %419 = vmatpush.msra.mxu1 %v2236_v25  ;;  %3278 = vst [vmem:[#allocation20_spill] sm:$0xff] %v2340_v57  ;;  %v2371_v2 = vld [vmem:[#allocation3 + $0x70] sm:$0xff]  ;;  %v2373_v3 = vld [vmem:[#allocation3 + $0x20] sm:$0xff]  ;;  %v2377_v7 = vld [vmem:[#allocation3 + $0x78] sm:$0xff] }
  0x25   :  { %438 = vmatpush.msra.mxu2 %v2240_v26  ;;  %458 = vmatpush.msra.mxu3 %v2242_v27  ;;  %3279 = vst [vmem:[#allocation21_spill] sm:$0xff] %v2342_v58  ;;  %v2381_v8 = vld [vmem:[#allocation3 + $0x28] sm:$0xff]  ;;  %v2383_v9 = vld [vmem:[#allocation3 + $0x50] sm:$0xff] }
  0x26   :  { %399 = vmatpush.msrb.mxu0 %v2244_v28  ;;  %420 = vmatpush.msra.mxu1 %v2247_v29  ;;  %3280 = vst [vmem:[#allocation22_spill] sm:$0xff] %v2351_v60 }
  0x27   :  { %439 = vmatpush.msra.mxu2 %v2252_v30  ;;  %459 = vmatpush.msra.mxu3 %v2254_v31  ;;  %3281 = vst [vmem:[#allocation23_spill] sm:$0xff] %v2357_v61 }
  0x28   :  { %1694 = vmatmul.msk.f32.gmra.mxu0 %vm95_vm1, %v68_v32  ;;  %421 = vmatpush.msra.mxu1 %v2266_v34  ;;  %3282 = vst [vmem:[#allocation24_spill] sm:$0xff] %v2359_v62 }
  0x29   :  { %1702 = vmatmul.msk.f32.gmra.mxu1 %vm95_vm1, %v67_v19  ;;  %1711 = vmatmul.msk.f32.gmra.mxu2 %vm95_vm1, %v67_v19  ;;  %3283 = vst [vmem:[#allocation25_spill] sm:$0xff] %v2363_v63 }
  0x2a   :  { %1720 = vmatmul.msk.f32.gmra.mxu3 %vm95_vm1, %v67_v19  ;;  %400 = vmatpush.msrb.mxu0 %v2263_v33  ;;  %3284 = vst [vmem:[#allocation26_spill] sm:$0xff] %v2365_v0  ;;  %v2385_v19 = vld [vmem:[#allocation3] sm:$0xff] }
  0x2b   :  { %440 = vmatpush.msra.mxu2 %v2271_v35  ;;  %460 = vmatpush.msra.mxu3 %v2273_v36  ;;  %3285 = vst [vmem:[#allocation27_spill] sm:$0xff] %v2369_v1 }
  0x2c   :  { %401 = vmatpush.msrb.mxu0 %v2277_v37  ;;  %422 = vmatpush.msra.mxu1 %v2279_v38  ;;  %3286 = vst [vmem:[#allocation28_spill] sm:$0xff] %v2371_v2 }
  0x2d   :  { %441 = vmatpush.msra.mxu2 %v2283_v39  ;;  %461 = vmatpush.msra.mxu3 %v2285_v40  ;;  %3287 = vst [vmem:[#allocation29_spill] sm:$0xff] %v2373_v3 }
  0x2e   :  { %402 = vmatpush.msrb.mxu0 %v2287_v41  ;;  %423 = vmatpush.msra.mxu1 %v2290_v42  ;;  %3288 = vst [vmem:[#allocation30_spill] sm:$0xff] %v2377_v7 }
  0x2f   :  { %442 = vmatpush.msra.mxu2 %v2295_v43  ;;  %462 = vmatpush.msra.mxu3 %v2297_v44  ;;  %3289 = vst [vmem:[#allocation31_spill] sm:$0xff] %v2381_v8 }
  0x30   :  { %1695 = vmatmul.msk.f32.gmra.mxu0 %vm95_vm1, %v69_v45  ;;  %424 = vmatpush.msra.mxu1 %v2309_v47  ;;  %3290 = vst [vmem:[#allocation32_spill] sm:$0xff] %v2383_v9 }
  0x31   :  { %1703 = vmatmul.msk.f32.gmra.mxu1 %vm95_vm1, %v68_v32  ;;  %1712 = vmatmul.msk.f32.gmra.mxu2 %vm95_vm1, %v68_v32  ;;  %3291 = vst [vmem:[#allocation33_spill] sm:$0xff] %v2385_v19 }
  0x32   :  { %1721 = vmatmul.msk.f32.gmra.mxu3 %vm95_vm1, %v68_v32  ;;  %403 = vmatpush.msrb.mxu0 %v2306_v46  ;;  %v2393_v32 = vld [vmem:[%s3171_s1] sm:$0xff] }
  0x33   :  { %443 = vmatpush.msra.mxu2 %v2314_v48  ;;  %463 = vmatpush.msra.mxu3 %v2316_v49 }
  0x34   :  { %404 = vmatpush.msrb.mxu0 %v2320_v50  ;;  %425 = vmatpush.msra.mxu1 %v2322_v51 }
  0x35   :  { %444 = vmatpush.msra.mxu2 %v2326_v52  ;;  %464 = vmatpush.msra.mxu3 %v2328_v53 }
  0x36   :  { %405 = vmatpush.msrb.mxu0 %v2330_v54  ;;  %426 = vmatpush.msra.mxu1 %v2333_v55 }
  0x37   :  { %445 = vmatpush.msra.mxu2 %v2338_v56  ;;  %465 = vmatpush.msra.mxu3 %v2340_v57 }
  0x38   :  { %406 = vmatpush.msrb.mxu0 %v2342_v58  ;;  %427 = vmatpush.msra.mxu1 %v2357_v61 }
  0x39   :  { %1704 = vmatmul.msk.f32.gmra.mxu1 %vm95_vm1, %v69_v45  ;;  %1696 = vmatmul.msk.f32.gmra.mxu0 %vm95_vm1, %v70_v59 }
  0x3a   :  { %1713 = vmatmul.msk.f32.gmra.mxu2 %vm95_vm1, %v69_v45  ;;  %1722 = vmatmul.msk.f32.gmra.mxu3 %vm95_vm1, %v69_v45  ;;  %v2398_v45 = vld [vmem:[#allocation3 + $0x8] sm:$0xff] }
  0x3b   :  { %407 = vmatpush.msrb.mxu0 %v2351_v60  ;;  %446 = vmatpush.msra.mxu2 %v2359_v62  ;;  %3292 = vst [vmem:[#allocation34_spill] sm:$0xff] %v2398_v45 }
  0x3c   :  { %466 = vmatpush.msra.mxu3 %v2365_v0  ;;  %428 = vmatpush.msra.mxu1 %v2369_v1  ;;  %v2402_v1 = vld [vmem:[#allocation3 + $0x58] sm:$0xff] }
  0x3d   :  { %408 = vmatpush.msrb.mxu0 %v2363_v63  ;;  %447 = vmatpush.msra.mxu2 %v2371_v2  ;;  %3293 = vst [vmem:[#allocation35_spill] sm:$0xff] %v2402_v1 }
  0x3e   :  { %467 = vmatpush.msra.mxu3 %v2377_v7  ;;  %429 = vmatpush.msra.mxu1 %v2381_v8  ;;  %v2410_v8 = vld [vmem:[#allocation3 + $0x38] sm:$0xff] }
  0x3f   :  { %409 = vmatpush.msrb.mxu0 %v2373_v3  ;;  %448 = vmatpush.msra.mxu2 %v2383_v9  ;;  %v2404_v3 = vld [vmem:[#allocation3 + $0x30] sm:$0xff]  ;;  %3295 = vst [vmem:[#allocation37_spill] sm:$0xff] %v2410_v8 }
  0x40   :  { %3294 = vst [vmem:[#allocation36_spill] sm:$0xff] %v2404_v3  ;;  %430 = vmatpush.msra.mxu1 %v2398_v45  ;;  %v2412_v9 = vld [vmem:[#allocation3 + $0x10] sm:$0xff]  ;;  %468 = vmatpush.msra.mxu3 %v2402_v1 }
  0x41   :  { %410 = vmatpush.msrb.mxu0 %v2385_v19  ;;  %1705 = vmatmul.msk.f32.gmra.mxu1 %vm95_vm1, %v70_v59  ;;  %3296 = vst [vmem:[#allocation38_spill] sm:$0xff] %v2412_v9  ;;  %v2416_v19 = vld [vmem:[#allocation3 + $0x18] sm:$0xff] }
  0x42   :  { %1714 = vmatmul.msk.f32.gmra.mxu2 %vm95_vm1, %v70_v59  ;;  %411 = vmatmul.f32.vlgmr.msrb.gmra.mxu0 %v2393_v32  ;;  %3297 = vst [vmem:[#allocation39_spill] sm:$0xff] %v2416_v19 }
  0x43   :  { %1723 = vmatmul.msk.f32.gmra.mxu3 %vm95_vm1, %v70_v59  ;;  %449 = vmatpush.msra.mxu2 %v2404_v3  ;;  %v3301_v59 = vld [vmem:[#allocation31_spill] sm:$0xff] }
  0x44   :  { %546 = vmatpush.msra.mxu0 %v2191_v11  ;;  %566 = vmatpush.msrb.mxu1 %v2185_v10 }
  0x45   :  { %469 = vmatpush.msra.mxu3 %v2410_v8  ;;  %450 = vmatpush.msra.mxu2 %v2412_v9 }
  0x46   :  { %547 = vmatpush.msra.mxu0 %v2203_v15  ;;  %567 = vmatpush.msrb.mxu1 %v2197_v13 }
  0x47   :  { %586 = vmatpush.msrb.mxu2 %v2193_v12  ;;  %470 = vmatpush.msra.mxu3 %v2416_v19 }
  0x48   :  { %548 = vmatpush.msra.mxu0 %v2220_v20  ;;  %568 = vmatpush.msrb.mxu1 %v2209_v17 }
  0x49   :  { %1706 = vmatmul.msk.f32.gmra.mxu1 %vm95_vm1, %v2166_v4  ;;  %606 = vmatpush.msrb.mxu3 %v2199_v14 }
  0x4a   :  { %1715 = vmatmul.msk.f32.gmra.mxu2 %vm95_vm1, %v2166_v4  ;;  %549 = vmatpush.msra.mxu0 %v2234_v24 }
  0x4b   :  { %1724 = vmatmul.msk.f32.gmra.mxu3 %vm95_vm1, %v2166_v4  ;;  %587 = vmatpush.msrb.mxu2 %v2205_v16  ;;  %v3298_v4 = vld [vmem:[#allocation27_spill] sm:$0xff] }
  0x4c   :  { %607 = vmatpush.msrb.mxu3 %v2211_v18  ;;  %569 = vmatpush.msrb.mxu1 %v2223_v21 }
  0x4d   :  { %588 = vmatpush.msrb.mxu2 %v2228_v22  ;;  %550 = vmatpush.msra.mxu0 %v2244_v28 }
  0x4e   :  { %608 = vmatpush.msrb.mxu3 %v2230_v23  ;;  %570 = vmatpush.msrb.mxu1 %v2236_v25 }
  0x4f   :  { %589 = vmatpush.msrb.mxu2 %v2240_v26  ;;  %551 = vmatpush.msra.mxu0 %v2263_v33 }
  0x50   :  { %609 = vmatpush.msrb.mxu3 %v2242_v27  ;;  %571 = vmatpush.msrb.mxu1 %v2247_v29 }
  0x51   :  { %1707 = vmatmul.msk.f32.gmra.mxu1 %vm95_vm1, %v2173_v5  ;;  %590 = vmatpush.msrb.mxu2 %v2252_v30 }
  0x52   :  { %1716 = vmatmul.msk.f32.gmra.mxu2 %vm95_vm1, %v2173_v5  ;;  %610 = vmatpush.msrb.mxu3 %v2254_v31 }
  0x53   :  { %1725 = vmatmul.msk.f32.gmra.mxu3 %vm95_vm1, %v2173_v5  ;;  %591 = vmatpush.msrb.mxu2 %v2271_v35  ;;  %v3299_v5 = vld [vmem:[#allocation32_spill] sm:$0xff] }
  0x54   :  { %611 = vmatpush.msrb.mxu3 %v2273_v36  ;;  %552 = vmatpush.msra.mxu0 %v2277_v37 }
  0x55   :  { %572 = vmatpush.msrb.mxu1 %v2266_v34  ;;  %592 = vmatpush.msrb.mxu2 %v2283_v39 }
  0x56   :  { %612 = vmatpush.msrb.mxu3 %v2285_v40  ;;  %553 = vmatpush.msra.mxu0 %v2287_v41 }
  0x57   :  { %573 = vmatpush.msrb.mxu1 %v2279_v38  ;;  %593 = vmatpush.msrb.mxu2 %v2295_v43 }
  0x58   :  { %613 = vmatpush.msrb.mxu3 %v2297_v44  ;;  %554 = vmatpush.msra.mxu0 %v2306_v46 }
  0x59   :  { %1708 = vmatmul.msk.f32.gmra.mxu1 %vm95_vm1, %v2178_v6  ;;  %594 = vmatpush.msrb.mxu2 %v2314_v48 }
  0x5a   :  { %1717 = vmatmul.msk.f32.gmra.mxu2 %vm95_vm1, %v2178_v6  ;;  %574 = vmatpush.msrb.mxu1 %v2290_v42 }
  0x5b   :  { %1726 = vmatmul.msk.f32.gmra.mxu3 %vm95_vm1, %v2178_v6  ;;  %555 = vmatpush.msra.mxu0 %v2320_v50  ;;  %v3300_v6 = vld [vmem:[#allocation29_spill] sm:$0xff] }
  0x5c   :  { %614 = vmatpush.msrb.mxu3 %v2316_v49  ;;  %575 = vmatpush.msrb.mxu1 %v2309_v47 }
  0x5d   :  { %595 = vmatpush.msrb.mxu2 %v2326_v52  ;;  %556 = vmatpush.msra.mxu0 %v2330_v54 }
  0x5e   :  { %615 = vmatpush.msrb.mxu3 %v2328_v53  ;;  %576 = vmatpush.msrb.mxu1 %v2322_v51 }
  0x5f   :  { %596 = vmatpush.msrb.mxu2 %v2338_v56  ;;  %557 = vmatpush.msra.mxu0 %v2342_v58 }
  0x60   :  { %616 = vmatpush.msrb.mxu3 %v2340_v57  ;;  %577 = vmatpush.msrb.mxu1 %v2333_v55 }
  0x61   :  { %431 = vmatmul.f32.vlgmr.msra.gmra.mxu1 %v2393_v32  ;;  %597 = vmatpush.msrb.mxu2 %v2359_v62 }
  0x62   :  { %451 = vmatmul.f32.vlgmr.msra.gmra.mxu2 %v2393_v32  ;;  %617 = vmatpush.msrb.mxu3 %v2365_v0 }
  0x63   :  { %471 = vmatmul.f32.vlgmr.msra.gmra.mxu3 %v2393_v32  ;;  %558 = vmatpush.msra.mxu0 %v2351_v60  ;;  %v3302_v32 = vld [vmem:[#allocation33_spill] sm:$0xff] }
  0x64   :  { %578 = vmatpush.msrb.mxu1 %v2357_v61  ;;  %598 = vmatpush.msrb.mxu2 %v2371_v2 }
  0x65   :  { %618 = vmatpush.msrb.mxu3 %v2377_v7  ;;  %559 = vmatpush.msra.mxu0 %v2363_v63 }
  0x66   :  { %579 = vmatpush.msrb.mxu1 %v3298_v4  ;;  %599 = vmatpush.msrb.mxu2 %v3299_v5 }
  0x67   :  { %619 = vmatpush.msrb.mxu3 %v2402_v1  ;;  %560 = vmatpush.msra.mxu0 %v3300_v6 }
  0x68   :  { %580 = vmatpush.msrb.mxu1 %v3301_v59  ;;  %600 = vmatpush.msrb.mxu2 %v2404_v3 }
  0x69   :  { %620 = vmatpush.msrb.mxu3 %v2410_v8  ;;  %561 = vmatpush.msra.mxu0 %v3302_v32 }
  0x6a   :  { %581 = vmatpush.msrb.mxu1 %v2398_v45  ;;  %601 = vmatpush.msrb.mxu2 %v2412_v9 }
  0x6b   :  { %621 = vmatpush.msrb.mxu3 %v2416_v19  ;;  %697 = vmatpush.msrb.mxu0 %v2191_v11 }
  0x6c   :  { %717 = vmatpush.msra.mxu1 %v2185_v10  ;;  %737 = vmatpush.msra.mxu2 %v2193_v12 }
  0x6d   :  { %757 = vmatpush.msra.mxu3 %v2199_v14  ;;  %698 = vmatpush.msrb.mxu0 %v2203_v15 }
  0x6e   :  { %718 = vmatpush.msra.mxu1 %v2197_v13  ;;  %738 = vmatpush.msra.mxu2 %v2205_v16 }
  0x6f   :  { %758 = vmatpush.msra.mxu3 %v2211_v18  ;;  %699 = vmatpush.msrb.mxu0 %v2220_v20 }
  0x70   :  { %719 = vmatpush.msra.mxu1 %v2209_v17  ;;  %739 = vmatpush.msra.mxu2 %v2228_v22 }
  0x71   :  { %759 = vmatpush.msra.mxu3 %v2230_v23  ;;  %700 = vmatpush.msrb.mxu0 %v2234_v24 }
  0x72   :  { %720 = vmatpush.msra.mxu1 %v2223_v21  ;;  %740 = vmatpush.msra.mxu2 %v2240_v26 }
  0x73   :  { %760 = vmatpush.msra.mxu3 %v2242_v27  ;;  %701 = vmatpush.msrb.mxu0 %v2244_v28 }
  0x74   :  { %721 = vmatpush.msra.mxu1 %v2236_v25  ;;  %741 = vmatpush.msra.mxu2 %v2252_v30 }
  0x75   :  { %761 = vmatpush.msra.mxu3 %v2254_v31  ;;  %702 = vmatpush.msrb.mxu0 %v2263_v33 }
  0x76   :  { %722 = vmatpush.msra.mxu1 %v2247_v29  ;;  %742 = vmatpush.msra.mxu2 %v2271_v35 }
  0x77   :  { %762 = vmatpush.msra.mxu3 %v2273_v36  ;;  %703 = vmatpush.msrb.mxu0 %v2277_v37 }
  0x78   :  { %723 = vmatpush.msra.mxu1 %v2266_v34  ;;  %743 = vmatpush.msra.mxu2 %v2283_v39 }
  0x79   :  { %763 = vmatpush.msra.mxu3 %v2285_v40  ;;  %704 = vmatpush.msrb.mxu0 %v2287_v41 }
  0x7a   :  { %724 = vmatpush.msra.mxu1 %v2279_v38  ;;  %744 = vmatpush.msra.mxu2 %v2295_v43 }
  0x7b   :  { %764 = vmatpush.msra.mxu3 %v2297_v44  ;;  %705 = vmatpush.msrb.mxu0 %v2306_v46 }
  0x7c   :  { %725 = vmatpush.msra.mxu1 %v2290_v42  ;;  %745 = vmatpush.msra.mxu2 %v2314_v48 }
  0x7d   :  { %765 = vmatpush.msra.mxu3 %v2316_v49  ;;  %706 = vmatpush.msrb.mxu0 %v2320_v50 }
  0x7e   :  { %726 = vmatpush.msra.mxu1 %v2309_v47  ;;  %746 = vmatpush.msra.mxu2 %v2326_v52 }
  0x7f   :  { %766 = vmatpush.msra.mxu3 %v2328_v53  ;;  %707 = vmatpush.msrb.mxu0 %v2330_v54 }
  0x80   :  { %727 = vmatpush.msra.mxu1 %v2322_v51  ;;  %747 = vmatpush.msra.mxu2 %v2338_v56 }
  0x81   :  { %767 = vmatpush.msra.mxu3 %v2340_v57  ;;  %708 = vmatpush.msrb.mxu0 %v2342_v58 }
  0x82   :  { %728 = vmatpush.msra.mxu1 %v2333_v55  ;;  %748 = vmatpush.msra.mxu2 %v2359_v62 }
  0x83   :  { %768 = vmatpush.msra.mxu3 %v2365_v0  ;;  %709 = vmatpush.msrb.mxu0 %v2351_v60 }
  0x84   :  { %729 = vmatpush.msra.mxu1 %v2357_v61  ;;  %749 = vmatpush.msra.mxu2 %v2371_v2 }
  0x85   :  { %769 = vmatpush.msra.mxu3 %v2377_v7  ;;  %710 = vmatpush.msrb.mxu0 %v2363_v63 }
  0x86   :  { %730 = vmatpush.msra.mxu1 %v3298_v4  ;;  %750 = vmatpush.msra.mxu2 %v3299_v5 }
  0x87   :  { %770 = vmatpush.msra.mxu3 %v2402_v1  ;;  %711 = vmatpush.msrb.mxu0 %v3300_v6  ;;  %v76_v1 = vld [vmem:[%s3175_s5] sm:$0xf] }
  0x88   :  { %731 = vmatpush.msra.mxu1 %v3301_v59  ;;  %751 = vmatpush.msra.mxu2 %v2404_v3  ;;  %v78_v5 = vperm.slane %v76_v1, 0 }
  0x89   :  { %771 = vmatpush.msra.mxu3 %v2410_v8  ;;  %712 = vmatpush.msrb.mxu0 %v3302_v32 }
  0x8a   :  { %732 = vmatpush.msra.mxu1 %v2398_v45  ;;  %752 = vmatpush.msra.mxu2 %v2412_v9 }
  0x8b   :  { %772 = vmatpush.msra.mxu3 %v2416_v19  ;;  %v79_v19 = vperm.slane %v76_v1, 1 }
  0x95   :  { %v146_v6 = vpop.f32.mrf.mxu0  ;;  %v161_v4 = vpop.f32.mrf.mxu1 }
  0x96   :  { %v2573_v59 = vadd.f32 %v161_v4, %v78_v5 }
  0x98   :  { %3303 = vst [vmem:[#allocation40_spill] sm:$0xff] %v2573_v59  ;;  %v80_v59 = vperm.slane %v76_v1, 2 }
  0x9c   :  { %v164_v3 = vpop.f32.mrf.mxu2  ;;  %v167_v63 = vpop.f32.mrf.mxu3 }
  0x9d   :  { %v2575_v8 = vadd.f32 %v164_v3, %v78_v5  ;;  %v2577_v32 = vadd.f32 %v167_v63, %v78_v5  ;;  %v149_v45 = vpop.f32.mrf.mxu0  ;;  %v2589_v3 = vperm.slane %v76_v1, 3 }
  0x9e   :  { %v187_v7 = vpop.f32.mrf.mxu1  ;;  %v2579_v9 = vadd.f32 %v149_v45, %v78_v5 }
  0x9f   :  { %3304 = vst [vmem:[#allocation41_spill] sm:$0xff] %v2575_v8 }
  0xa0   :  { %3305 = vst [vmem:[#allocation42_spill] sm:$0xff] %v2577_v32 }
  0xa1   :  { %3306 = vst [vmem:[#allocation43_spill] sm:$0xff] %v2579_v9 }
  0xa4   :  { %v2581_v2 = vpop.f32.mrf.mxu2 }
  0xa5   :  { %v2583_v61 = vpop.f32.mrf.mxu3  ;;  %v152_v60 = vpop.f32.mrf.mxu0 }
  0xa6   :  { %v190_v0 = vpop.f32.mrf.mxu1  ;;  %v2585_v62 = vadd.f32 %v152_v60, %v78_v5 }
  0xa7   :  { %v2587_v4 = vadd.f32 %v190_v0, %v79_v19 }
  0xa8   :  { %3307 = vst [vmem:[#allocation44_spill] sm:$0xff] %v2585_v62 }
  0xa9   :  { %3308 = vst [vmem:[#allocation45_spill] sm:$0xff] %v2587_v4 }
  0xac   :  { %v231_v63 = vpop.f32.mrf.mxu2 }
  0xad   :  { %v272_v32 = vpop.f32.mrf.mxu3  ;;  %v2591_v8 = vadd.f32 %v231_v63, %v80_v59  ;;  %v155_v9 = vpop.f32.mrf.mxu0 }
  0xae   :  { %v2594_v45 = vadd.f32 %v272_v32, %v2589_v3  ;;  %v193_v55 = vpop.f32.mrf.mxu1  ;;  %v2596_v58 = vadd.f32 %v155_v9, %v78_v5 }
  0xaf   :  { %3309 = vst [vmem:[#allocation46_spill] sm:$0xff] %v2591_v8  ;;  %v2598_v57 = vadd.f32 %v193_v55, %v79_v19 }
  0xb0   :  { %3310 = vst [vmem:[#allocation47_spill] sm:$0xff] %v2594_v45 }
  0xb1   :  { %3311 = vst [vmem:[#allocation48_spill] sm:$0xff] %v2596_v58 }
  0xb2   :  { %3312 = vst [vmem:[#allocation49_spill] sm:$0xff] %v2598_v57 }
  0xb4   :  { %v234_v60 = vpop.f32.mrf.mxu2 }
  0xb5   :  { %v275_v62 = vpop.f32.mrf.mxu3  ;;  %v2600_v0 = vadd.f32 %v234_v60, %v80_v59 }
  0xb6   :  { %v2603_v1 = vadd.f32 %v275_v62, %v2589_v3  ;;  %v196_v4 = vpop.f32.mrf.mxu1  ;;  %v158_v56 = vpop.f32.mrf.mxu0 }
  0xb7   :  { %3313 = vst [vmem:[#allocation50_spill] sm:$0xff] %v2600_v0  ;;  %v2605_v63 = vadd.f32 %v196_v4, %v79_v19  ;;  %v2607_v8 = vadd.f32 %v158_v56, %v78_v5 }
  0xb8   :  { %3314 = vst [vmem:[#allocation51_spill] sm:$0xff] %v2603_v1 }
  0xb9   :  { %3315 = vst [vmem:[#allocation52_spill] sm:$0xff] %v2605_v63 }
  0xba   :  { %3316 = vst [vmem:[#allocation53_spill] sm:$0xff] %v2607_v8 }
  0xbd   :  { %v237_v32 = vpop.f32.mrf.mxu2  ;;  %v278_v9 = vpop.f32.mrf.mxu3 }
  0xbe   :  { %v2609_v45 = vadd.f32 %v237_v32, %v80_v59  ;;  %v199_v58 = vpop.f32.mrf.mxu1  ;;  %v2612_v55 = vadd.f32 %v278_v9, %v2589_v3  ;;  %v147_v32 = vadd.f32 %v146_v6, %v78_v5 }
  0xbf   :  { %v2614_v57 = vadd.f32 %v199_v58, %v79_v19  ;;  %v412_v8 = vpop.f32.mrf.mxu0 }
  0xc0   :  { %3317 = vst [vmem:[#allocation54_spill] sm:$0xff] %v2609_v45  ;;  %v475_v45 = vadd.f32 %v412_v8, %v147_v32  ;;  %v188_v32 = vadd.f32 %v187_v7, %v79_v19 }
  0xc1   :  { %3318 = vst [vmem:[#allocation55_spill] sm:$0xff] %v2612_v55 }
  0xc2   :  { %3319 = vst [vmem:[#allocation56_spill] sm:$0xff] %v2614_v57  ;;  %v1727_v58 = vmul.f32 -1.442695, %v475_v45 }
  0xc4   :  { %1764 = vpow2.f32 %v1727_v58 }
  0xc5   :  { %v240_v60 = vpop.f32.mrf.mxu2 }
  0xc6   :  { %v2616_v0 = vadd.f32 %v240_v60, %v80_v59  ;;  %v281_v62 = vpop.f32.mrf.mxu3  ;;  %v202_v1 = vpop.f32.mrf.mxu1 }
  0xc7   :  { %v2619_v4 = vadd.f32 %v281_v62, %v2589_v3  ;;  %v2621_v56 = vadd.f32 %v202_v1, %v79_v19 }
  0xc8   :  { %3320 = vst [vmem:[#allocation57_spill] sm:$0xff] %v2616_v0 }
  0xc9   :  { %3321 = vst [vmem:[#allocation58_spill] sm:$0xff] %v2619_v4 }
  0xca   :  { %3322 = vst [vmem:[#allocation59_spill] sm:$0xff] %v2621_v56  ;;  %v1765_v6 = vpop.eup %1764 }
  0xcd   :  { %v243_v63 = vpop.f32.mrf.mxu2 }
  0xce   :  { %v2623_v51 = vadd.f32 %v243_v63, %v80_v59  ;;  %v284_v9 = vpop.f32.mrf.mxu3  ;;  %v205_v55 = vpop.f32.mrf.mxu1  ;;  %v488_v63 = vadd.f32 1.0, %v1765_v6 }
  0xcf   :  { %v2626_v57 = vadd.f32 %v284_v9, %v2589_v3  ;;  %v2628_v60 = vadd.f32 %v205_v55, %v79_v19 }
  0xd0   :  { %3323 = vst [vmem:[#allocation60_spill] sm:$0xff] %v2623_v51  ;;  %1766 = vrcp.f32 %v488_v63  ;;  %vm496_vm3 = vweird.f32 %v488_v63 }
  0xd1   :  { %3324 = vst [vmem:[#allocation61_spill] sm:$0xff] %v2626_v57 }
  0xd2   :  { %3325 = vst [vmem:[#allocation62_spill] sm:$0xff] %v2628_v60 }
  0xd5   :  { %v246_v0 = vpop.f32.mrf.mxu2 }
  0xd6   :  { %v2630_v62 = vadd.f32 %v246_v0, %v80_v59  ;;  %v287_v1 = vpop.f32.mrf.mxu3  ;;  %v208_v56 = vpop.f32.mrf.mxu1 }
  0xd7   :  { %v2633_v5 = vadd.f32 %v287_v1, %v2589_v3  ;;  %v2635_v8 = vadd.f32 %v208_v56, %v79_v19  ;;  %v229_v1 = vadd.f32 %v2581_v2, %v80_v59  ;;  %v1767_v56 = vpop.eup %1766 }
  0xd8   :  { %3326 = vst [vmem:[#allocation63_spill] sm:$0xff] %v2630_v62  ;;  %v492_v7 = vmul.f32 %v1767_v56, %v488_v63  ;;  %vm497_vm2 = vweird.f32 %v1767_v56 }
  0xd9   :  { %3327 = vst [vmem:[#allocation64_spill] sm:$0xff] %v2633_v5  ;;  %vm2645_vm5 = vmor %vm496_vm3, %vm497_vm2 }
  0xda   :  { %3328 = vst [vmem:[#allocation65_spill] sm:$0xff] %v2635_v8 }
  0xdd   :  { %v249_v45 = vpop.f32.mrf.mxu2 }
  0xde   :  { %v2637_v51 = vadd.f32 %v249_v45, %v80_v59  ;;  %v290_v9 = vpop.f32.mrf.mxu3  ;;  %v432_v55 = vpop.f32.mrf.mxu1  ;;  %v493_v45 = vsub.f32 1.0, %v492_v7 }
  0xdf   :  { %v2640_v58 = vadd.f32 %v290_v9, %v2589_v3  ;;  %v476_v0 = vadd.f32 %v432_v55, %v188_v32  ;;  %v270_v9 = vadd.f32 %v2583_v61, %v2589_v3 }
  0xe0   :  { %3329 = vst [vmem:[#allocation66_spill] sm:$0xff] %v2637_v51 }
  0xe1   :  { %3330 = vst [vmem:[#allocation67_spill] sm:$0xff] %v2640_v58  ;;  %v1728_v62 = vmul.f32 -1.442695, %v476_v0 }
  0xe3   :  { %1768 = vpow2.f32 %v1728_v62  ;;  %v494_v62 = vmul.f32 %v1767_v56, %v493_v45 }
  0xe5   :  { %v452_v5 = vpop.f32.mrf.mxu2 }
  0xe6   :  { %v477_v8 = vadd.f32 %v452_v5, %v229_v1  ;;  %v472_v51 = vpop.f32.mrf.mxu3  ;;  %v495_v5 = vadd.f32 %v1767_v56, %v494_v62  ;;  %v326_v62 = vld [vmem:[%s3172_s2] sm:$0xff]  ;;  %s2090_s2 = smov [#allocation9]  }
  0xe7   :  { %v478_v55 = vadd.f32 %v472_v51, %v270_v9  ;;  %s1658_s4 = sshll.u32 %s2090_s2, 4  ;;  %s1659_s4 = int_to_ptr.vmem [resolvable:$true] %s1658_s4 }
  0xe8   :  { %v1729_v60 = vmul.f32 -1.442695, %v477_v8  ;;  %v499_v3 = vsel %vm2645_vm5, %v1767_v56, %v495_v5 }
  0xe9   :  { %v1769_v6 = vpop.eup %1768 }
  0xea   :  { %v489_v19 = vadd.f32 1.0, %v1769_v6  ;;  %1770 = vpow2.f32 %v1729_v60  ;;  %v502_v60 = vand.u32 2147483648, %v488_v63  ;;  %v500_v6 = vand.u32 2147483647, %v488_v63 }
  0xec   :  { %1772 = vrcp.f32 %v489_v19  ;;  %v517_v8 = vand.u32 2147483648, %v489_v19  ;;  %v515_v7 = vand.u32 2147483647, %v489_v19  ;;  %vm511_vm6 = vweird.f32 %v489_v19 }
  0xed   :  { %v503_v63 = vor.u32 1.1754944e-38, %v502_v60  ;;  %vm501_vm8 = vcmp.eq.f32.partialorder %v500_v6, 8.507059e+37 }
  0xee   :  { %vm516_vm9 = vcmp.eq.f32.partialorder %v515_v7, 8.507059e+37 }
  0xef   :  { %v504_v57 = vsel %vm501_vm8, %v503_v63, %v499_v3 }
  0xf0   :  { %v1771_v32 = vpop.eup %1770 }
  0xf1   :  { %v490_v0 = vadd.f32 1.0, %v1771_v32  ;;  %v518_v32 = vor.u32 1.1754944e-38, %v517_v8 }
  0xf2   :  { %v1773_v58 = vpop.eup %1772 }
  0xf3   :  { %v507_v2 = vmul.f32 %v1773_v58, %v489_v19  ;;  %1774 = vrcp.f32 %v490_v0  ;;  %vm512_vm4 = vweird.f32 %v1773_v58  ;;  %v532_v8 = vand.u32 2147483648, %v490_v0 }
  0xf4   :  { %1776 = vtanh.f32 %v478_v55  ;;  %vm513_vm7 = vmor %vm511_vm6, %vm512_vm4  ;;  %vm526_vm11 = vweird.f32 %v490_v0 }
  0xf5   :  { %v508_v59 = vsub.f32 1.0, %v507_v2  ;;  %v533_v6 = vor.u32 1.1754944e-38, %v532_v8 }
  0xf7   :  { %v509_v1 = vmul.f32 %v1773_v58, %v508_v59 }
  0xf9   :  { %v1775_v51 = vpop.eup %1774  ;;  %v510_v45 = vadd.f32 %v1773_v58, %v509_v1  ;;  %v530_v1 = vand.u32 2147483647, %v490_v0 }
  0xfa   :  { %v1777_v9 = vpop.eup %1776  ;;  %v522_v55 = vmul.f32 %v1775_v51, %v490_v0  ;;  %vm527_vm10 = vweird.f32 %v1775_v51 }
  0xfb   :  { %v514_v2 = vsel %vm513_vm7, %v1773_v58, %v510_v45  ;;  %v538_v54 = vmul.f32 %v1777_v9, %v504_v57  ;;  %vm528_vm12 = vmor %vm526_vm11, %vm527_vm10  ;;  %vm531_vm13 = vcmp.eq.f32.partialorder %v530_v1, 8.507059e+37 }
  0xfc   :  { %v523_v59 = vsub.f32 1.0, %v522_v55  ;;  %v519_v4 = vsel %vm516_vm9, %v518_v32, %v514_v2 }
  0xfd   :  { %v537_v19 = vmul.f32 %v519_v4, %v326_v62 }
  0xfe   :  { %v524_v61 = vmul.f32 %v1775_v51, %v523_v59 }
  0xff   :  { %v2654_v56 = vadd.f32 %v538_v54, %v537_v19 }
 0x100   :  { %v525_v5 = vadd.f32 %v1775_v51, %v524_v61 }
 0x101   :  { %1778 = vtanh.f32 %v2654_v56 }
 0x102   :  { %v529_v60 = vsel %vm528_vm12, %v1775_v51, %v525_v5  ;;  %v3360_v51 = vld [vmem:[#allocation47_spill] sm:$0xff] }
 0x103   :  { %v534_v7 = vsel %vm531_vm13, %v533_v6, %v529_v60 }
 0x107   :  { %v1779_v58 = vpop.eup %1778 }
 0x108   :  { %v541_v3 = vmul.f32 %v1779_v58, %v534_v7 }
 0x10a   :  { %562 = vmatmul.f32.vlgmr.msra.gmra.mxu0 %v541_v3  ;;  %582 = vmatmul.f32.vlgmr.msrb.gmra.mxu1 %v541_v3 }
 0x10b   :  { %602 = vmatmul.f32.vlgmr.msrb.gmra.mxu2 %v541_v3  ;;  %622 = vmatmul.f32.vlgmr.msrb.gmra.mxu3 %v541_v3 }
 0x10c   :  { %848 = vmatpush.msra.mxu0 %v2191_v11  ;;  %868 = vmatpush.msrb.mxu1 %v2185_v10  ;;  %v3333_v10 = vld [vmem:[#allocation17_spill] sm:$0xff]  ;;  %v3334_v11 = vld [vmem:[#allocation16_spill] sm:$0xff] }
 0x10d   :  { %888 = vmatpush.msrb.mxu2 %v2193_v12  ;;  %908 = vmatpush.msrb.mxu3 %v2199_v14  ;;  %v3335_v12 = vld [vmem:[#allocation19_spill] sm:$0xff]  ;;  %v3337_v14 = vld [vmem:[#allocation21_spill] sm:$0xff] }
 0x10e   :  { %849 = vmatpush.msra.mxu0 %v2203_v15  ;;  %869 = vmatpush.msrb.mxu1 %v2197_v13  ;;  %v3336_v13 = vld [vmem:[#allocation20_spill] sm:$0xff]  ;;  %v3338_v15 = vld [vmem:[#allocation18_spill] sm:$0xff] }
 0x10f   :  { %889 = vmatpush.msrb.mxu2 %v2205_v16  ;;  %909 = vmatpush.msrb.mxu3 %v2211_v18  ;;  %v3339_v16 = vld [vmem:[#allocation24_spill] sm:$0xff]  ;;  %v3341_v18 = vld [vmem:[#allocation22_spill] sm:$0xff] }
 0x110   :  { %850 = vmatpush.msra.mxu0 %v2220_v20  ;;  %870 = vmatpush.msrb.mxu1 %v2209_v17  ;;  %v3340_v17 = vld [vmem:[#allocation26_spill] sm:$0xff]  ;;  %v3342_v20 = vld [vmem:[#allocation23_spill] sm:$0xff] }
 0x111   :  { %890 = vmatpush.msrb.mxu2 %v2228_v22  ;;  %910 = vmatpush.msrb.mxu3 %v2230_v23  ;;  %v3344_v22 = vld [vmem:[#allocation30_spill] sm:$0xff]  ;;  %v3345_v23 = vld [vmem:[#allocation25_spill] sm:$0xff] }
 0x112   :  { %851 = vmatpush.msra.mxu0 %v2234_v24  ;;  %871 = vmatpush.msrb.mxu1 %v2223_v21  ;;  %v3343_v21 = vld [vmem:[#allocation28_spill] sm:$0xff]  ;;  %v3346_v24 = vld [vmem:[#allocation27_spill] sm:$0xff] }
 0x113   :  { %891 = vmatpush.msrb.mxu2 %v2240_v26  ;;  %911 = vmatpush.msrb.mxu3 %v2242_v27  ;;  %v3348_v26 = vld [vmem:[#allocation35_spill] sm:$0xff]  ;;  %v3349_v27 = vld [vmem:[#allocation29_spill] sm:$0xff] }
 0x114   :  { %852 = vmatpush.msra.mxu0 %v2244_v28  ;;  %872 = vmatpush.msrb.mxu1 %v2236_v25  ;;  %v3347_v25 = vld [vmem:[#allocation32_spill] sm:$0xff]  ;;  %v3350_v28 = vld [vmem:[#allocation31_spill] sm:$0xff] }
 0x115   :  { %892 = vmatpush.msrb.mxu2 %v2252_v30  ;;  %912 = vmatpush.msrb.mxu3 %v2254_v31  ;;  %v3352_v30 = vld [vmem:[#allocation37_spill] sm:$0xff] }
 0x116   :  { %853 = vmatpush.msra.mxu0 %v2263_v33  ;;  %873 = vmatpush.msrb.mxu1 %v2247_v29  ;;  %v3351_v29 = vld [vmem:[#allocation36_spill] sm:$0xff]  ;;  %v3353_v31 = vld [vmem:[#allocation33_spill] sm:$0xff]  ;;  %v3354_v33 = vld [vmem:[#allocation34_spill] sm:$0xff] }
 0x117   :  { %893 = vmatpush.msrb.mxu2 %v2271_v35  ;;  %913 = vmatpush.msrb.mxu3 %v2273_v36  ;;  %v3356_v35 = vld [vmem:[#allocation39_spill] sm:$0xff] }
 0x118   :  { %854 = vmatpush.msra.mxu0 %v2277_v37  ;;  %874 = vmatpush.msrb.mxu1 %v2266_v34  ;;  %v3355_v34 = vld [vmem:[#allocation38_spill] sm:$0xff] }
 0x119   :  { %894 = vmatpush.msrb.mxu2 %v2283_v39  ;;  %914 = vmatpush.msrb.mxu3 %v2285_v40  ;;  %v3358_v40 = vld [vmem:[#allocation45_spill] sm:$0xff] }
 0x11a   :  { %855 = vmatpush.msra.mxu0 %v2287_v41  ;;  %875 = vmatpush.msrb.mxu1 %v2279_v38  ;;  %v3357_v38 = vld [vmem:[#allocation43_spill] sm:$0xff] }
 0x11b   :  { %895 = vmatpush.msrb.mxu2 %v2295_v43  ;;  %915 = vmatpush.msrb.mxu3 %v2297_v44 }
 0x11c   :  { %856 = vmatpush.msra.mxu0 %v2306_v46  ;;  %876 = vmatpush.msrb.mxu1 %v2290_v42  ;;  %v3359_v46 = vld [vmem:[#allocation46_spill] sm:$0xff] }
 0x11d   :  { %896 = vmatpush.msrb.mxu2 %v2314_v48  ;;  %916 = vmatpush.msrb.mxu3 %v2316_v49 }
 0x11e   :  { %857 = vmatpush.msra.mxu0 %v2320_v50  ;;  %877 = vmatpush.msrb.mxu1 %v2309_v47 }
 0x11f   :  { %897 = vmatpush.msrb.mxu2 %v2326_v52  ;;  %917 = vmatpush.msrb.mxu3 %v2328_v53 }
 0x120   :  { %858 = vmatpush.msra.mxu0 %v3333_v10  ;;  %878 = vmatpush.msrb.mxu1 %v3334_v11 }
 0x121   :  { %898 = vmatpush.msrb.mxu2 %v3335_v12  ;;  %918 = vmatpush.msrb.mxu3 %v3336_v13 }
 0x122   :  { %859 = vmatpush.msra.mxu0 %v3337_v14  ;;  %879 = vmatpush.msrb.mxu1 %v3338_v15 }
 0x123   :  { %899 = vmatpush.msrb.mxu2 %v3339_v16  ;;  %919 = vmatpush.msrb.mxu3 %v3340_v17 }
 0x124   :  { %860 = vmatpush.msra.mxu0 %v3341_v18  ;;  %880 = vmatpush.msrb.mxu1 %v3342_v20 }
 0x125   :  { %900 = vmatpush.msrb.mxu2 %v3343_v21  ;;  %920 = vmatpush.msrb.mxu3 %v3344_v22 }
 0x126   :  { %861 = vmatpush.msra.mxu0 %v3345_v23  ;;  %881 = vmatpush.msrb.mxu1 %v3346_v24 }
 0x127   :  { %901 = vmatpush.msrb.mxu2 %v3347_v25  ;;  %921 = vmatpush.msrb.mxu3 %v3348_v26 }
 0x128   :  { %862 = vmatpush.msra.mxu0 %v3349_v27  ;;  %882 = vmatpush.msrb.mxu1 %v3350_v28 }
 0x129   :  { %902 = vmatpush.msrb.mxu2 %v3351_v29  ;;  %922 = vmatpush.msrb.mxu3 %v3352_v30 }
 0x12a   :  { %863 = vmatpush.msra.mxu0 %v3353_v31  ;;  %883 = vmatpush.msrb.mxu1 %v3354_v33 }
 0x12b   :  { %903 = vmatpush.msrb.mxu2 %v3355_v34  ;;  %923 = vmatpush.msrb.mxu3 %v3356_v35 }
 0x187   :  { %v563_v36 = vpop.f32.mrf.mxu0  ;;  %v583_v37 = vpop.f32.mrf.mxu1 }
 0x188   :  { %v626_v39 = vadd.f32 %v563_v36, %v3357_v38  ;;  %v627_v41 = vadd.f32 %v583_v37, %v3358_v40  ;;  %v2732_v38 = vld [vmem:[#allocation3 + $0x1e8] sm:$0xff]  ;;  %v2738_v40 = vld [vmem:[#allocation3 + $0x1f8] sm:$0xff] }
 0x18a   :  { %v1730_v42 = vmul.f32 -1.442695, %v626_v39  ;;  %v1731_v43 = vmul.f32 -1.442695, %v627_v41  ;;  %v2735_v39 = vld [vmem:[#allocation3 + $0x1f0] sm:$0xff]  ;;  %v2741_v41 = vld [vmem:[#allocation3 + $0x1c0] sm:$0xff] }
 0x18c   :  { %1780 = vpow2.f32 %v1730_v42  ;;  %v2744_v42 = vld [vmem:[#allocation3 + $0x1c8] sm:$0xff] }
 0x18d   :  { %1782 = vpow2.f32 %v1731_v43  ;;  %v2747_v43 = vld [vmem:[#allocation3 + $0x1d0] sm:$0xff] }
 0x18e   :  { %v603_v44 = vpop.f32.mrf.mxu2  ;;  %v623_v54 = vpop.f32.mrf.mxu3 }
 0x18f   :  { %v628_v47 = vadd.f32 %v603_v44, %v3359_v46  ;;  %v629_v45 = vadd.f32 %v623_v54, %v3360_v51  ;;  %v2750_v44 = vld [vmem:[#allocation3 + $0x1d8] sm:$0xff]  ;;  %v2753_v46 = vld [vmem:[#allocation3 + $0x1a0] sm:$0xff] }
 0x190   :  { %v2774_v54 = vld [vmem:[#allocation3 + $0x198] sm:$0xff] }
 0x191   :  { %v1732_v48 = vmul.f32 -1.442695, %v628_v47  ;;  %v2756_v47 = vld [vmem:[#allocation3 + $0x1a8] sm:$0xff]  ;;  %v2786_v51 = vld [vmem:[#allocation3 + $0x178] sm:$0xff] }
 0x192   :  { %v1781_v49 = vpop.eup %1780 }
 0x193   :  { %v1783_v50 = vpop.eup %1782  ;;  %v639_v52 = vadd.f32 1.0, %v1781_v49  ;;  %1784 = vpow2.f32 %v1732_v48  ;;  %v2759_v48 = vld [vmem:[#allocation3 + $0x1b0] sm:$0xff]  ;;  %v2762_v49 = vld [vmem:[#allocation3 + $0x1b8] sm:$0xff] }
 0x194   :  { %v640_v53 = vadd.f32 1.0, %v1783_v50  ;;  %v2765_v50 = vld [vmem:[#allocation3 + $0x180] sm:$0xff] }
 0x195   :  { %1786 = vrcp.f32 %v639_v52  ;;  %v653_v2 = vand.u32 2147483648, %v639_v52  ;;  %v651_v61 = vand.u32 2147483647, %v639_v52  ;;  %vm647_vm0 = vweird.f32 %v639_v52 }
 0x196   :  { %1788 = vrcp.f32 %v640_v53  ;;  %v668_v59 = vand.u32 2147483648, %v640_v53  ;;  %v666_v8 = vand.u32 2147483647, %v640_v53  ;;  %vm662_vm1 = vweird.f32 %v640_v53 }
 0x197   :  { %v654_v58 = vor.u32 1.1754944e-38, %v653_v2  ;;  %vm652_vm4 = vcmp.eq.f32.partialorder %v651_v61, 8.507059e+37  ;;  %v2807_v2 = vld [vmem:[#allocation3 + $0x130] sm:$0xff]  ;;  %v2816_v61 = vld [vmem:[#allocation3 + $0x108] sm:$0xff] }
 0x198   :  { %v669_v3 = vor.u32 1.1754944e-38, %v668_v59  ;;  %vm667_vm5 = vcmp.eq.f32.partialorder %v666_v8, 8.507059e+37  ;;  %v2810_v59 = vld [vmem:[#allocation3 + $0x138] sm:$0xff] }
 0x199   :  { %v1785_v57 = vpop.eup %1784  ;;  %v2822_v8 = vld [vmem:[#allocation3 + $0x118] sm:$0xff] }
 0x19a   :  { %v641_v4 = vadd.f32 1.0, %v1785_v57  ;;  %v2777_v57 = vld [vmem:[#allocation3 + $0x160] sm:$0xff] }
 0x19b   :  { %v1787_v0 = vpop.eup %1786 }
 0x19c   :  { %v1789_v9 = vpop.eup %1788  ;;  %v643_v32 = vmul.f32 %v1787_v0, %v639_v52  ;;  %1790 = vrcp.f32 %v641_v4  ;;  %vm648_vm14 = vweird.f32 %v1787_v0  ;;  %v683_v23 = vand.u32 2147483648, %v641_v4  ;;  %v2768_v52 = vld [vmem:[#allocation3 + $0x188] sm:$0xff] }
 0x19d   :  { %v658_v55 = vmul.f32 %v1789_v9, %v640_v53  ;;  %1792 = vtanh.f32 %v629_v45  ;;  %vm663_vm15 = vweird.f32 %v1789_v9  ;;  %vm649_vm2 = vmor %vm647_vm0, %vm648_vm14  ;;  %vm677_vm7 = vweird.f32 %v641_v4  ;;  %v2771_v53 = vld [vmem:[#allocation3 + $0x190] sm:$0xff]  ;;  %v2789_v45 = vld [vmem:[#allocation3 + $0x140] sm:$0xff] }
 0x19e   :  { %v644_v62 = vsub.f32 1.0, %v643_v32  ;;  %vm664_vm3 = vmor %vm662_vm1, %vm663_vm15  ;;  %v681_v24 = vand.u32 2147483647, %v641_v4  ;;  %v684_v28 = vor.u32 1.1754944e-38, %v683_v23  ;;  %v2795_v32 = vld [vmem:[#allocation3 + $0x150] sm:$0xff]  ;;  %v2873_v23 = vld [vmem:[#allocation3 + $0x60] sm:$0xff] }
 0x19f   :  { %v659_v63 = vsub.f32 1.0, %v658_v55  ;;  %v2798_v55 = vld [vmem:[#allocation3 + $0x158] sm:$0xff]  ;;  %3371 = vst [vmem:[#allocation28_spill] sm:$0xff] %v2873_v23 }
 0x1a0   :  { %v645_v19 = vmul.f32 %v1787_v0, %v644_v62  ;;  %vm682_vm9 = vcmp.eq.f32.partialorder %v681_v24, 8.507059e+37  ;;  %v2801_v62 = vld [vmem:[#allocation3 + $0x120] sm:$0xff]  ;;  %v2876_v24 = vld [vmem:[#allocation3 + $0x68] sm:$0xff] }
 0x1a1   :  { %v660_v5 = vmul.f32 %v1789_v9, %v659_v63  ;;  %v2804_v63 = vld [vmem:[#allocation3 + $0x128] sm:$0xff]  ;;  %3372 = vst [vmem:[#allocation30_spill] sm:$0xff] %v2876_v24 }
 0x1a2   :  { %v1791_v1 = vpop.eup %1790  ;;  %v646_v60 = vadd.f32 %v1787_v0, %v645_v19  ;;  %v2813_v19 = vld [vmem:[#allocation3 + $0x100] sm:$0xff] }
 0x1a3   :  { %v673_v6 = vmul.f32 %v1791_v1, %v641_v4  ;;  %v661_v7 = vadd.f32 %v1789_v9, %v660_v5  ;;  %v1793_v11 = vpop.eup %1792  ;;  %vm678_vm6 = vweird.f32 %v1791_v1  ;;  %v2780_v4 = vld [vmem:[#allocation3 + $0x168] sm:$0xff]  ;;  %v2819_v5 = vld [vmem:[#allocation3 + $0x110] sm:$0xff] }
 0x1a4   :  { %v650_v10 = vsel %vm649_vm2, %v1787_v0, %v646_v60  ;;  %vm679_vm8 = vmor %vm677_vm7, %vm678_vm6  ;;  %v2783_v0 = vld [vmem:[#allocation3 + $0x170] sm:$0xff]  ;;  %v2828_v60 = vld [vmem:[#allocation3 + $0xe8] sm:$0xff] }
 0x1a5   :  { %v674_v12 = vsub.f32 1.0, %v673_v6  ;;  %v655_v13 = vsel %vm652_vm4, %v654_v58, %v650_v10  ;;  %v665_v14 = vsel %vm664_vm3, %v1789_v9, %v661_v7  ;;  %v2792_v9 = vld [vmem:[#allocation3 + $0x148] sm:$0xff]  ;;  %v2831_v6 = vld [vmem:[#allocation3 + $0xf0] sm:$0xff]  ;;  %v2834_v58 = vld [vmem:[#allocation3 + $0xf8] sm:$0xff] }
 0x1a6   :  { %v670_v15 = vsel %vm667_vm5, %v669_v3, %v665_v14  ;;  %v689_v16 = vmul.f32 %v1793_v11, %v655_v13  ;;  %v2837_v7 = vld [vmem:[#allocation3 + $0xc0] sm:$0xff]  ;;  %v2840_v3 = vld [vmem:[#allocation3 + $0xc8] sm:$0xff]  ;;  %v2843_v10 = vld [vmem:[#allocation3 + $0xd0] sm:$0xff] }
 0x1a7   :  { %v688_v17 = vmul.f32 %v670_v15, %v2654_v56  ;;  %v675_v18 = vmul.f32 %v1791_v1, %v674_v12  ;;  %v2729_v56 = vld [vmem:[#allocation3 + $0x1e0] sm:$0xff]  ;;  %3361 = vst [vmem:[#allocation17_spill] sm:$0xff] %v2843_v10  ;;  %v2846_v11 = vld [vmem:[#allocation3 + $0xd8] sm:$0xff]  ;;  %v2852_v13 = vld [vmem:[#allocation3 + $0xa8] sm:$0xff] }
 0x1a8   :  { %3362 = vst [vmem:[#allocation16_spill] sm:$0xff] %v2846_v11  ;;  %v2849_v12 = vld [vmem:[#allocation3 + $0xa0] sm:$0xff]  ;;  %v2855_v14 = vld [vmem:[#allocation3 + $0xb0] sm:$0xff]  ;;  %v2858_v15 = vld [vmem:[#allocation3 + $0xb8] sm:$0xff] }
 0x1a9   :  { %v2726_v20 = vadd.f32 %v689_v16, %v688_v17  ;;  %v676_v21 = vadd.f32 %v1791_v1, %v675_v18  ;;  %3363 = vst [vmem:[#allocation19_spill] sm:$0xff] %v2849_v12  ;;  %v2861_v16 = vld [vmem:[#allocation3 + $0x80] sm:$0xff]  ;;  %v2864_v17 = vld [vmem:[#allocation3 + $0x88] sm:$0xff]  ;;  %v2867_v18 = vld [vmem:[#allocation3 + $0x90] sm:$0xff] }
 0x1aa   :  { %3364 = vst [vmem:[#allocation20_spill] sm:$0xff] %v2852_v13 }
 0x1ab   :  { %1794 = vtanh.f32 %v2726_v20  ;;  %v680_v27 = vsel %vm679_vm8, %v1791_v1, %v676_v21  ;;  %v2825_v1 = vld [vmem:[#allocation3 + $0xe0] sm:$0xff]  ;;  %3365 = vst [vmem:[#allocation21_spill] sm:$0xff] %v2855_v14  ;;  %v2870_v21 = vld [vmem:[#allocation3 + $0x98] sm:$0xff] }
 0x1ac   :  { %v685_v36 = vsel %vm682_vm9, %v684_v28, %v680_v27  ;;  %3366 = vst [vmem:[#allocation18_spill] sm:$0xff] %v2858_v15  ;;  %v2879_v27 = vld [vmem:[#allocation3 + $0x70] sm:$0xff]  ;;  %v2883_v28 = vld [vmem:[#allocation3 + $0x40] sm:$0xff] }
 0x1ad   :  { %3367 = vst [vmem:[#allocation24_spill] sm:$0xff] %v2861_v16 }
 0x1ae   :  { %3368 = vst [vmem:[#allocation26_spill] sm:$0xff] %v2864_v17 }
 0x1af   :  { %3369 = vst [vmem:[#allocation22_spill] sm:$0xff] %v2867_v18 }
 0x1b0   :  { %3370 = vst [vmem:[#allocation23_spill] sm:$0xff] %v2870_v21 }
 0x1b1   :  { %v1795_v31 = vpop.eup %1794  ;;  %3373 = vst [vmem:[#allocation25_spill] sm:$0xff] %v2879_v27 }
 0x1b2   :  { %v692_v37 = vmul.f32 %v1795_v31, %v685_v36  ;;  %3374 = vst [vmem:[#allocation27_spill] sm:$0xff] %v2883_v28  ;;  %v2886_v31 = vld [vmem:[#allocation3 + $0x48] sm:$0xff]  ;;  %v2891_v36 = vld [vmem:[#allocation3 + $0x20] sm:$0xff] }
 0x1b3   :  { %3375 = vst [vmem:[#allocation32_spill] sm:$0xff] %v2886_v31 }
 0x1b4   :  { %713 = vmatmul.f32.vlgmr.msrb.gmra.mxu0 %v692_v37  ;;  %733 = vmatmul.f32.vlgmr.msra.gmra.mxu1 %v692_v37  ;;  %3376 = vst [vmem:[#allocation35_spill] sm:$0xff] %v2891_v36 }
 0x1b5   :  { %753 = vmatmul.f32.vlgmr.msra.gmra.mxu2 %v692_v37  ;;  %773 = vmatmul.f32.vlgmr.msra.gmra.mxu3 %v692_v37  ;;  %v2894_v37 = vld [vmem:[#allocation3 + $0x28] sm:$0xff] }
 0x1b6   :  { %999 = vmatpush.msrb.mxu0 %v2729_v56  ;;  %1019 = vmatpush.msra.mxu1 %v2732_v38  ;;  %3377 = vst [vmem:[#allocation29_spill] sm:$0xff] %v2894_v37 }
 0x1b7   :  { %1039 = vmatpush.msra.mxu2 %v2735_v39  ;;  %1059 = vmatpush.msra.mxu3 %v2738_v40 }
 0x1b8   :  { %1000 = vmatpush.msrb.mxu0 %v2741_v41  ;;  %1020 = vmatpush.msra.mxu1 %v2744_v42 }
 0x1b9   :  { %1040 = vmatpush.msra.mxu2 %v2747_v43  ;;  %1060 = vmatpush.msra.mxu3 %v2750_v44 }
 0x1ba   :  { %1001 = vmatpush.msrb.mxu0 %v2753_v46  ;;  %1021 = vmatpush.msra.mxu1 %v2756_v47 }
 0x1bb   :  { %1041 = vmatpush.msra.mxu2 %v2759_v48  ;;  %1061 = vmatpush.msra.mxu3 %v2762_v49 }
 0x1bc   :  { %1002 = vmatpush.msrb.mxu0 %v2765_v50  ;;  %1022 = vmatpush.msra.mxu1 %v2768_v52 }
 0x1bd   :  { %1042 = vmatpush.msra.mxu2 %v2771_v53  ;;  %1062 = vmatpush.msra.mxu3 %v2774_v54 }
 0x1be   :  { %1003 = vmatpush.msrb.mxu0 %v2777_v57  ;;  %1023 = vmatpush.msra.mxu1 %v2780_v4 }
 0x1bf   :  { %1043 = vmatpush.msra.mxu2 %v2783_v0  ;;  %1063 = vmatpush.msra.mxu3 %v2786_v51 }
 0x1c0   :  { %1004 = vmatpush.msrb.mxu0 %v2789_v45  ;;  %1024 = vmatpush.msra.mxu1 %v2792_v9 }
 0x1c1   :  { %1044 = vmatpush.msra.mxu2 %v2795_v32  ;;  %1064 = vmatpush.msra.mxu3 %v2798_v55 }
 0x1c2   :  { %1005 = vmatpush.msrb.mxu0 %v2801_v62  ;;  %1025 = vmatpush.msra.mxu1 %v2804_v63 }
 0x1c3   :  { %1045 = vmatpush.msra.mxu2 %v2807_v2  ;;  %1065 = vmatpush.msra.mxu3 %v2810_v59 }
 0x1c4   :  { %1006 = vmatpush.msrb.mxu0 %v2813_v19  ;;  %1026 = vmatpush.msra.mxu1 %v2816_v61 }
 0x1c5   :  { %1046 = vmatpush.msra.mxu2 %v2819_v5  ;;  %1066 = vmatpush.msra.mxu3 %v2822_v8 }
 0x1c6   :  { %1007 = vmatpush.msrb.mxu0 %v2825_v1  ;;  %1027 = vmatpush.msra.mxu1 %v2828_v60 }
 0x1c7   :  { %1047 = vmatpush.msra.mxu2 %v2831_v6  ;;  %1067 = vmatpush.msra.mxu3 %v2834_v58 }
 0x1c8   :  { %1008 = vmatpush.msrb.mxu0 %v2837_v7  ;;  %1028 = vmatpush.msra.mxu1 %v2840_v3 }
 0x1c9   :  { %1048 = vmatpush.msra.mxu2 %v2843_v10  ;;  %1068 = vmatpush.msra.mxu3 %v2846_v11 }
 0x1ca   :  { %1009 = vmatpush.msrb.mxu0 %v2849_v12  ;;  %1029 = vmatpush.msra.mxu1 %v2852_v13 }
 0x1cb   :  { %1049 = vmatpush.msra.mxu2 %v2855_v14  ;;  %1069 = vmatpush.msra.mxu3 %v2858_v15 }
 0x1cc   :  { %1010 = vmatpush.msrb.mxu0 %v2861_v16  ;;  %1030 = vmatpush.msra.mxu1 %v2864_v17 }
 0x1cd   :  { %1050 = vmatpush.msra.mxu2 %v2867_v18  ;;  %1070 = vmatpush.msra.mxu3 %v2870_v21 }
 0x1ce   :  { %1011 = vmatpush.msrb.mxu0 %v2873_v23  ;;  %1031 = vmatpush.msra.mxu1 %v2876_v24  ;;  %v3381_v24 = vld [vmem:[#allocation50_spill] sm:$0xff] }
 0x1cf   :  { %1051 = vmatpush.msra.mxu2 %v2879_v27  ;;  %1071 = vmatpush.msra.mxu3 %v3344_v22  ;;  %v2899_v22 = vld [vmem:[#allocation3] sm:$0xff] }
 0x1d0   :  { %1012 = vmatpush.msrb.mxu0 %v2883_v28  ;;  %1032 = vmatpush.msra.mxu1 %v2886_v31  ;;  %3378 = vst [vmem:[#allocation31_spill] sm:$0xff] %v2899_v22  ;;  %v3380_v28 = vld [vmem:[#allocation49_spill] sm:$0xff] }
 0x1d1   :  { %1052 = vmatpush.msra.mxu2 %v3347_v25  ;;  %1072 = vmatpush.msra.mxu3 %v3348_v26 }
 0x1d2   :  { %1013 = vmatpush.msrb.mxu0 %v2891_v36  ;;  %1033 = vmatpush.msra.mxu1 %v2894_v37  ;;  %v3379_v36 = vld [vmem:[#allocation44_spill] sm:$0xff] }
 0x1d3   :  { %1053 = vmatpush.msra.mxu2 %v3351_v29  ;;  %1073 = vmatpush.msra.mxu3 %v3352_v30 }
 0x1d4   :  { %1014 = vmatpush.msrb.mxu0 %v2899_v22  ;;  %1034 = vmatpush.msra.mxu1 %v3354_v33 }
 0x1d5   :  { %1054 = vmatpush.msra.mxu2 %v3355_v34  ;;  %1074 = vmatpush.msra.mxu3 %v3356_v35 }
 0x231   :  { %v714_v25 = vpop.f32.mrf.mxu0  ;;  %v734_v26 = vpop.f32.mrf.mxu1 }
 0x232   :  { %v777_v31 = vadd.f32 %v714_v25, %v3379_v36  ;;  %v778_v37 = vadd.f32 %v734_v26, %v3380_v28  ;;  %v3382_v28 = vld [vmem:[#allocation51_spill] sm:$0xff] }
 0x234   :  { %v1733_v27 = vmul.f32 -1.442695, %v777_v31  ;;  %v1734_v29 = vmul.f32 -1.442695, %v778_v37 }
 0x236   :  { %1796 = vpow2.f32 %v1733_v27 }
 0x237   :  { %1798 = vpow2.f32 %v1734_v29 }
 0x238   :  { %v754_v30 = vpop.f32.mrf.mxu2  ;;  %v774_v35 = vpop.f32.mrf.mxu3 }
 0x239   :  { %v779_v23 = vadd.f32 %v754_v30, %v3381_v24  ;;  %v780_v31 = vadd.f32 %v774_v35, %v3382_v28 }
 0x23b   :  { %v1735_v22 = vmul.f32 -1.442695, %v779_v23 }
 0x23c   :  { %v1797_v21 = vpop.eup %1796 }
 0x23d   :  { %v1799_v33 = vpop.eup %1798  ;;  %v790_v18 = vadd.f32 1.0, %v1797_v21  ;;  %1800 = vpow2.f32 %v1735_v22 }
 0x23e   :  { %v791_v34 = vadd.f32 1.0, %v1799_v33 }
 0x23f   :  { %1802 = vrcp.f32 %v790_v18  ;;  %v804_v23 = vand.u32 2147483648, %v790_v18  ;;  %v802_v22 = vand.u32 2147483647, %v790_v18  ;;  %vm798_vm12 = vweird.f32 %v790_v18 }
 0x240   :  { %1804 = vrcp.f32 %v791_v34  ;;  %v819_v30 = vand.u32 2147483648, %v791_v34  ;;  %v817_v16 = vand.u32 2147483647, %v791_v34  ;;  %vm813_vm13 = vweird.f32 %v791_v34 }
 0x241   :  { %v805_v28 = vor.u32 1.1754944e-38, %v804_v23  ;;  %vm803_vm0 = vcmp.eq.f32.partialorder %v802_v22, 8.507059e+37 }
 0x242   :  { %vm818_vm1 = vcmp.eq.f32.partialorder %v817_v16, 8.507059e+37 }
 0x243   :  { %v1801_v17 = vpop.eup %1800 }
 0x244   :  { %v792_v36 = vadd.f32 1.0, %v1801_v17 }
 0x245   :  { %v1803_v25 = vpop.eup %1802 }
 0x246   :  { %v1805_v37 = vpop.eup %1804  ;;  %v794_v27 = vmul.f32 %v1803_v25, %v790_v18  ;;  %1806 = vrcp.f32 %v792_v36  ;;  %vm799_vm10 = vweird.f32 %v1803_v25  ;;  %v834_v23 = vand.u32 2147483648, %v792_v36 }
 0x247   :  { %v809_v26 = vmul.f32 %v1805_v37, %v791_v34  ;;  %1808 = vtanh.f32 %v780_v31  ;;  %vm814_vm11 = vweird.f32 %v1805_v37  ;;  %vm800_vm14 = vmor %vm798_vm12, %vm799_vm10  ;;  %vm828_vm3 = vweird.f32 %v792_v36 }
 0x248   :  { %v795_v29 = vsub.f32 1.0, %v794_v27  ;;  %vm815_vm15 = vmor %vm813_vm13, %vm814_vm11  ;;  %v820_v27 = vor.u32 1.1754944e-38, %v819_v30  ;;  %v835_v22 = vor.u32 1.1754944e-38, %v834_v23  ;;  %v3401_v23 = vld [vmem:[#allocation35_spill] sm:$0xff] }
 0x249   :  { %v810_v24 = vsub.f32 1.0, %v809_v26 }
 0x24a   :  { %v796_v21 = vmul.f32 %v1803_v25, %v795_v29 }
 0x24b   :  { %v811_v33 = vmul.f32 %v1805_v37, %v810_v24 }
 0x24c   :  { %v1807_v15 = vpop.eup %1806  ;;  %v797_v17 = vadd.f32 %v1803_v25, %v796_v21 }
 0x24d   :  { %v824_v35 = vmul.f32 %v1807_v15, %v792_v36  ;;  %v812_v14 = vadd.f32 %v1805_v37, %v811_v33  ;;  %v1809_v31 = vpop.eup %1808  ;;  %vm829_vm2 = vweird.f32 %v1807_v15  ;;  %v3390_v33 = vld [vmem:[#allocation26_spill] sm:$0xff] }
 0x24e   :  { %v801_v26 = vsel %vm800_vm14, %v1803_v25, %v797_v17  ;;  %v832_v25 = vand.u32 2147483647, %v792_v36  ;;  %vm830_vm4 = vmor %vm828_vm3, %vm829_vm2  ;;  %v3388_v36 = vld [vmem:[#allocation18_spill] sm:$0xff] }
 0x24f   :  { %v825_v13 = vsub.f32 1.0, %v824_v35  ;;  %v806_v29 = vsel %vm803_vm0, %v805_v28, %v801_v26  ;;  %v816_v12 = vsel %vm815_vm15, %v1805_v37, %v812_v14  ;;  %v3389_v37 = vld [vmem:[#allocation24_spill] sm:$0xff]  ;;  %v3391_v17 = vld [vmem:[#allocation22_spill] sm:$0xff]  ;;  %v3392_v35 = vld [vmem:[#allocation23_spill] sm:$0xff] }
 0x250   :  { %v821_v24 = vsel %vm818_vm1, %v820_v27, %v816_v12  ;;  %v840_v11 = vmul.f32 %v1809_v31, %v806_v29  ;;  %vm833_vm5 = vcmp.eq.f32.partialorder %v832_v25, 8.507059e+37  ;;  %v3393_v28 = vld [vmem:[#allocation28_spill] sm:$0xff]  ;;  %v3394_v27 = vld [vmem:[#allocation30_spill] sm:$0xff]  ;;  %v3395_v26 = vld [vmem:[#allocation25_spill] sm:$0xff] }
 0x251   :  { %v839_v10 = vmul.f32 %v821_v24, %v2726_v20  ;;  %v826_v21 = vmul.f32 %v1807_v15, %v825_v13  ;;  %v3383_v20 = vld [vmem:[#allocation17_spill] sm:$0xff]  ;;  %v3386_v13 = vld [vmem:[#allocation20_spill] sm:$0xff]  ;;  %v3397_v29 = vld [vmem:[#allocation27_spill] sm:$0xff] }
 0x252   :  { %v2964_v31 = vld [vmem:[#allocation3 + $0x78] sm:$0xff]  ;;  %v3402_v25 = vld [vmem:[#allocation29_spill] sm:$0xff] }
 0x253   :  { %v2910_v18 = vadd.f32 %v840_v11, %v839_v10  ;;  %v827_v34 = vadd.f32 %v1807_v15, %v826_v21  ;;  %v3384_v10 = vld [vmem:[#allocation16_spill] sm:$0xff]  ;;  %v3385_v11 = vld [vmem:[#allocation19_spill] sm:$0xff]  ;;  %3396 = vst [vmem:[#allocation36_spill] sm:$0xff] %v2964_v31 }
 0x254   :  { %v3398_v24 = vld [vmem:[#allocation32_spill] sm:$0xff]  ;;  %v2969_v21 = vld [vmem:[#allocation3 + $0x50] sm:$0xff] }
 0x255   :  { %1810 = vtanh.f32 %v2910_v18  ;;  %v831_v30 = vsel %vm830_vm4, %v1807_v15, %v827_v34  ;;  %v3387_v15 = vld [vmem:[#allocation21_spill] sm:$0xff]  ;;  %3399 = vst [vmem:[#allocation37_spill] sm:$0xff] %v2969_v21  ;;  %v2972_v34 = vld [vmem:[#allocation3 + $0x58] sm:$0xff] }
 0x256   :  { %v836_v16 = vsel %vm833_vm5, %v835_v22, %v831_v30  ;;  %3400 = vst [vmem:[#allocation33_spill] sm:$0xff] %v2972_v34  ;;  %v2977_v30 = vld [vmem:[#allocation3 + $0x30] sm:$0xff]  ;;  %v2980_v22 = vld [vmem:[#allocation3 + $0x38] sm:$0xff] }
 0x257   :  { %3403 = vst [vmem:[#allocation34_spill] sm:$0xff] %v2977_v30 }
 0x258   :  { %3404 = vst [vmem:[#allocation38_spill] sm:$0xff] %v2980_v22 }
 0x25b   :  { %v1811_v14 = vpop.eup %1810 }
 0x25c   :  { %v843_v12 = vmul.f32 %v1811_v14, %v836_v16  ;;  %v3405_v14 = vld [vmem:[#allocation31_spill] sm:$0xff]  ;;  %v2984_v16 = vld [vmem:[#allocation3 + $0x8] sm:$0xff] }
 0x25d   :  { %3406 = vst [vmem:[#allocation39_spill] sm:$0xff] %v2984_v16 }
 0x25e   :  { %864 = vmatmul.f32.vlgmr.msra.gmra.mxu0 %v843_v12  ;;  %884 = vmatmul.f32.vlgmr.msrb.gmra.mxu1 %v843_v12 }
 0x25f   :  { %904 = vmatmul.f32.vlgmr.msrb.gmra.mxu2 %v843_v12  ;;  %924 = vmatmul.f32.vlgmr.msrb.gmra.mxu3 %v843_v12  ;;  %v2987_v12 = vld [vmem:[#allocation3 + $0x10] sm:$0xff] }
 0x260   :  { %1150 = vmatpush.msra.mxu0 %v2729_v56  ;;  %1170 = vmatpush.msrb.mxu1 %v2732_v38  ;;  %3407 = vst [vmem:[#allocation43_spill] sm:$0xff] %v2987_v12 }
 0x261   :  { %1190 = vmatpush.msrb.mxu2 %v2735_v39  ;;  %1210 = vmatpush.msrb.mxu3 %v2738_v40 }
 0x262   :  { %1151 = vmatpush.msra.mxu0 %v2741_v41  ;;  %1171 = vmatpush.msrb.mxu1 %v2744_v42 }
 0x263   :  { %1191 = vmatpush.msrb.mxu2 %v2747_v43  ;;  %1211 = vmatpush.msrb.mxu3 %v2750_v44 }
 0x264   :  { %1152 = vmatpush.msra.mxu0 %v2753_v46  ;;  %1172 = vmatpush.msrb.mxu1 %v2756_v47 }
 0x265   :  { %1192 = vmatpush.msrb.mxu2 %v2759_v48  ;;  %1212 = vmatpush.msrb.mxu3 %v2762_v49 }
 0x266   :  { %1153 = vmatpush.msra.mxu0 %v2765_v50  ;;  %1173 = vmatpush.msrb.mxu1 %v2768_v52 }
 0x267   :  { %1193 = vmatpush.msrb.mxu2 %v2771_v53  ;;  %1213 = vmatpush.msrb.mxu3 %v2774_v54 }
 0x268   :  { %1154 = vmatpush.msra.mxu0 %v2777_v57  ;;  %1174 = vmatpush.msrb.mxu1 %v2780_v4 }
 0x269   :  { %1194 = vmatpush.msrb.mxu2 %v2783_v0  ;;  %1214 = vmatpush.msrb.mxu3 %v2786_v51 }
 0x26a   :  { %1155 = vmatpush.msra.mxu0 %v2789_v45  ;;  %1175 = vmatpush.msrb.mxu1 %v2792_v9 }
 0x26b   :  { %1195 = vmatpush.msrb.mxu2 %v2795_v32  ;;  %1215 = vmatpush.msrb.mxu3 %v2798_v55 }
 0x26c   :  { %1156 = vmatpush.msra.mxu0 %v2801_v62  ;;  %1176 = vmatpush.msrb.mxu1 %v2804_v63 }
 0x26d   :  { %1196 = vmatpush.msrb.mxu2 %v2807_v2  ;;  %1216 = vmatpush.msrb.mxu3 %v2810_v59 }
 0x26e   :  { %1157 = vmatpush.msra.mxu0 %v2813_v19  ;;  %1177 = vmatpush.msrb.mxu1 %v2816_v61 }
 0x26f   :  { %1197 = vmatpush.msrb.mxu2 %v2819_v5  ;;  %1217 = vmatpush.msrb.mxu3 %v2822_v8 }
 0x270   :  { %1158 = vmatpush.msra.mxu0 %v2825_v1  ;;  %1178 = vmatpush.msrb.mxu1 %v2828_v60 }
 0x271   :  { %1198 = vmatpush.msrb.mxu2 %v2831_v6  ;;  %1218 = vmatpush.msrb.mxu3 %v2834_v58 }
 0x272   :  { %1159 = vmatpush.msra.mxu0 %v2837_v7  ;;  %1179 = vmatpush.msrb.mxu1 %v2840_v3 }
 0x273   :  { %1199 = vmatpush.msrb.mxu2 %v3383_v20  ;;  %1219 = vmatpush.msrb.mxu3 %v3384_v10 }
 0x274   :  { %1160 = vmatpush.msra.mxu0 %v3385_v11  ;;  %1180 = vmatpush.msrb.mxu1 %v3386_v13 }
 0x275   :  { %1200 = vmatpush.msrb.mxu2 %v3387_v15  ;;  %1220 = vmatpush.msrb.mxu3 %v3388_v36 }
 0x276   :  { %1161 = vmatpush.msra.mxu0 %v3389_v37  ;;  %1181 = vmatpush.msrb.mxu1 %v3390_v33 }
 0x277   :  { %1201 = vmatpush.msrb.mxu2 %v3391_v17  ;;  %1221 = vmatpush.msrb.mxu3 %v3392_v35 }
 0x278   :  { %1162 = vmatpush.msra.mxu0 %v3393_v28  ;;  %1182 = vmatpush.msrb.mxu1 %v3394_v27 }
 0x279   :  { %1202 = vmatpush.msrb.mxu2 %v3395_v26  ;;  %1222 = vmatpush.msrb.mxu3 %v2964_v31 }
 0x27a   :  { %1163 = vmatpush.msra.mxu0 %v3397_v29  ;;  %1183 = vmatpush.msrb.mxu1 %v3398_v24  ;;  %v3410_v24 = vld [vmem:[#allocation52_spill] sm:$0xff] }
 0x27b   :  { %1203 = vmatpush.msrb.mxu2 %v2969_v21  ;;  %1223 = vmatpush.msrb.mxu3 %v2972_v34  ;;  %v3409_v34 = vld [vmem:[#allocation48_spill] sm:$0xff] }
 0x27c   :  { %1164 = vmatpush.msra.mxu0 %v3401_v23  ;;  %1184 = vmatpush.msrb.mxu1 %v3402_v25  ;;  %v2990_v23 = vld [vmem:[#allocation3 + $0x18] sm:$0xff] }
 0x27d   :  { %1204 = vmatpush.msrb.mxu2 %v2977_v30  ;;  %1224 = vmatpush.msrb.mxu3 %v2980_v22  ;;  %3408 = vst [vmem:[#allocation45_spill] sm:$0xff] %v2990_v23 }
 0x27e   :  { %1165 = vmatpush.msra.mxu0 %v3405_v14  ;;  %1185 = vmatpush.msrb.mxu1 %v2984_v16  ;;  %v3411_v16 = vld [vmem:[#allocation54_spill] sm:$0xff] }
 0x27f   :  { %1205 = vmatpush.msrb.mxu2 %v2987_v12  ;;  %1225 = vmatpush.msrb.mxu3 %v2990_v23 }
 0x2db   :  { %v865_v25 = vpop.f32.mrf.mxu0  ;;  %v885_v30 = vpop.f32.mrf.mxu1 }
 0x2dc   :  { %v928_v21 = vadd.f32 %v865_v25, %v3409_v34  ;;  %v929_v22 = vadd.f32 %v885_v30, %v3410_v24  ;;  %v3412_v24 = vld [vmem:[#allocation55_spill] sm:$0xff] }
 0x2de   :  { %v1736_v29 = vmul.f32 -1.442695, %v928_v21  ;;  %v1737_v14 = vmul.f32 -1.442695, %v929_v22 }
 0x2e0   :  { %1812 = vpow2.f32 %v1736_v29 }
 0x2e1   :  { %1814 = vpow2.f32 %v1737_v14 }
 0x2e2   :  { %v905_v31 = vpop.f32.mrf.mxu2  ;;  %v925_v23 = vpop.f32.mrf.mxu3 }
 0x2e3   :  { %v930_v26 = vadd.f32 %v905_v31, %v3411_v16  ;;  %v931_v21 = vadd.f32 %v925_v23, %v3412_v24 }
 0x2e5   :  { %v1738_v27 = vmul.f32 -1.442695, %v930_v26 }
 0x2e6   :  { %v1813_v28 = vpop.eup %1812 }
 0x2e7   :  { %v1815_v12 = vpop.eup %1814  ;;  %v941_v35 = vadd.f32 1.0, %v1813_v28  ;;  %1816 = vpow2.f32 %v1738_v27 }
 0x2e8   :  { %v942_v17 = vadd.f32 1.0, %v1815_v12 }
 0x2e9   :  { %1818 = vrcp.f32 %v941_v35  ;;  %v955_v26 = vand.u32 2147483648, %v941_v35  ;;  %v953_v27 = vand.u32 2147483647, %v941_v35  ;;  %vm949_vm8 = vweird.f32 %v941_v35 }
 0x2ea   :  { %1820 = vrcp.f32 %v942_v17  ;;  %v970_v16 = vand.u32 2147483648, %v942_v17  ;;  %v968_v37 = vand.u32 2147483647, %v942_v17  ;;  %vm964_vm9 = vweird.f32 %v942_v17 }
 0x2eb   :  { %v956_v24 = vor.u32 1.1754944e-38, %v955_v26  ;;  %vm954_vm12 = vcmp.eq.f32.partialorder %v953_v27, 8.507059e+37 }
 0x2ec   :  { %vm969_vm13 = vcmp.eq.f32.partialorder %v968_v37, 8.507059e+37 }
 0x2ed   :  { %v1817_v33 = vpop.eup %1816 }
 0x2ee   :  { %v943_v34 = vadd.f32 1.0, %v1817_v33 }
 0x2ef   :  { %v1819_v25 = vpop.eup %1818 }
 0x2f0   :  { %v1821_v30 = vpop.eup %1820  ;;  %v945_v29 = vmul.f32 %v1819_v25, %v941_v35  ;;  %1822 = vrcp.f32 %v943_v34  ;;  %vm950_vm6 = vweird.f32 %v1819_v25  ;;  %v985_v26 = vand.u32 2147483648, %v943_v34 }
 0x2f1   :  { %v960_v22 = vmul.f32 %v1821_v30, %v942_v17  ;;  %1824 = vtanh.f32 %v931_v21  ;;  %vm965_vm7 = vweird.f32 %v1821_v30  ;;  %vm951_vm10 = vmor %vm949_vm8, %vm950_vm6  ;;  %vm979_vm15 = vweird.f32 %v943_v34 }
 0x2f2   :  { %v946_v14 = vsub.f32 1.0, %v945_v29  ;;  %vm966_vm11 = vmor %vm964_vm9, %vm965_vm7  ;;  %v971_v29 = vor.u32 1.1754944e-38, %v970_v16  ;;  %v986_v27 = vor.u32 1.1754944e-38, %v985_v26  ;;  %v3431_v26 = vld [vmem:[#allocation35_spill] sm:$0xff] }
 0x2f3   :  { %v961_v31 = vsub.f32 1.0, %v960_v22 }
 0x2f4   :  { %v947_v28 = vmul.f32 %v1819_v25, %v946_v14 }
 0x2f5   :  { %v962_v12 = vmul.f32 %v1821_v30, %v961_v31 }
 0x2f6   :  { %v1823_v36 = vpop.eup %1822  ;;  %v948_v33 = vadd.f32 %v1819_v25, %v947_v28 }
 0x2f7   :  { %v975_v23 = vmul.f32 %v1823_v36, %v943_v34  ;;  %v963_v15 = vadd.f32 %v1821_v30, %v962_v12  ;;  %v1825_v21 = vpop.eup %1824  ;;  %vm980_vm14 = vweird.f32 %v1823_v36  ;;  %v3420_v12 = vld [vmem:[#allocation26_spill] sm:$0xff] }
 0x2f8   :  { %v952_v22 = vsel %vm951_vm10, %v1819_v25, %v948_v33  ;;  %v983_v25 = vand.u32 2147483647, %v943_v34  ;;  %vm981_vm0 = vmor %vm979_vm15, %vm980_vm14  ;;  %v3418_v34 = vld [vmem:[#allocation18_spill] sm:$0xff] }
 0x2f9   :  { %v976_v13 = vsub.f32 1.0, %v975_v23  ;;  %v957_v14 = vsel %vm954_vm12, %v956_v24, %v952_v22  ;;  %v967_v11 = vsel %vm966_vm11, %v1821_v30, %v963_v15  ;;  %v3419_v30 = vld [vmem:[#allocation24_spill] sm:$0xff]  ;;  %v3421_v33 = vld [vmem:[#allocation22_spill] sm:$0xff]  ;;  %v3422_v23 = vld [vmem:[#allocation23_spill] sm:$0xff] }
 0x2fa   :  { %v972_v31 = vsel %vm969_vm13, %v971_v29, %v967_v11  ;;  %v991_v10 = vmul.f32 %v1825_v21, %v957_v14  ;;  %vm984_vm1 = vcmp.eq.f32.partialorder %v983_v25, 8.507059e+37  ;;  %v3423_v24 = vld [vmem:[#allocation28_spill] sm:$0xff]  ;;  %v3424_v29 = vld [vmem:[#allocation30_spill] sm:$0xff]  ;;  %v3425_v22 = vld [vmem:[#allocation25_spill] sm:$0xff] }
 0x2fb   :  { %v990_v20 = vmul.f32 %v972_v31, %v2910_v18  ;;  %v977_v28 = vmul.f32 %v1823_v36, %v976_v13  ;;  %v3413_v18 = vld [vmem:[#allocation17_spill] sm:$0xff]  ;;  %v3416_v13 = vld [vmem:[#allocation20_spill] sm:$0xff]  ;;  %v3427_v14 = vld [vmem:[#allocation27_spill] sm:$0xff] }
 0x2fc   :  { %v3426_v21 = vld [vmem:[#allocation36_spill] sm:$0xff]  ;;  %v3432_v25 = vld [vmem:[#allocation29_spill] sm:$0xff] }
 0x2fd   :  { %v2998_v35 = vadd.f32 %v991_v10, %v990_v20  ;;  %v978_v17 = vadd.f32 %v1823_v36, %v977_v28  ;;  %v3414_v20 = vld [vmem:[#allocation16_spill] sm:$0xff]  ;;  %v3415_v10 = vld [vmem:[#allocation19_spill] sm:$0xff]  ;;  %v3429_v28 = vld [vmem:[#allocation37_spill] sm:$0xff] }
 0x2fe   :  { %v3428_v31 = vld [vmem:[#allocation32_spill] sm:$0xff] }
 0x2ff   :  { %1826 = vtanh.f32 %v2998_v35  ;;  %v982_v16 = vsel %vm981_vm0, %v1823_v36, %v978_v17  ;;  %v3417_v36 = vld [vmem:[#allocation21_spill] sm:$0xff] }
 0x300   :  { %v987_v37 = vsel %vm984_vm1, %v986_v27, %v982_v16  ;;  %v3430_v17 = vld [vmem:[#allocation33_spill] sm:$0xff]  ;;  %v3433_v16 = vld [vmem:[#allocation34_spill] sm:$0xff] }
 0x301   :  { %v3434_v27 = vld [vmem:[#allocation38_spill] sm:$0xff] }
 0x305   :  { %v1827_v15 = vpop.eup %1826 }
 0x306   :  { %v994_v11 = vmul.f32 %v1827_v15, %v987_v37  ;;  %v3435_v15 = vld [vmem:[#allocation31_spill] sm:$0xff] }
 0x307   :  { %v3436_v37 = vld [vmem:[#allocation39_spill] sm:$0xff] }
 0x308   :  { %1015 = vmatmul.f32.vlgmr.msrb.gmra.mxu0 %v994_v11  ;;  %1035 = vmatmul.f32.vlgmr.msra.gmra.mxu1 %v994_v11 }
 0x309   :  { %1055 = vmatmul.f32.vlgmr.msra.gmra.mxu2 %v994_v11  ;;  %1075 = vmatmul.f32.vlgmr.msra.gmra.mxu3 %v994_v11  ;;  %v3437_v11 = vld [vmem:[#allocation43_spill] sm:$0xff] }
 0x30a   :  { %1301 = vmatpush.msrb.mxu0 %v2729_v56  ;;  %1321 = vmatpush.msra.mxu1 %v2732_v38 }
 0x30b   :  { %1341 = vmatpush.msra.mxu2 %v2735_v39  ;;  %1361 = vmatpush.msra.mxu3 %v2738_v40 }
 0x30c   :  { %1302 = vmatpush.msrb.mxu0 %v2741_v41  ;;  %1322 = vmatpush.msra.mxu1 %v2744_v42 }
 0x30d   :  { %1342 = vmatpush.msra.mxu2 %v2747_v43  ;;  %1362 = vmatpush.msra.mxu3 %v2750_v44 }
 0x30e   :  { %1303 = vmatpush.msrb.mxu0 %v2753_v46  ;;  %1323 = vmatpush.msra.mxu1 %v2756_v47 }
 0x30f   :  { %1343 = vmatpush.msra.mxu2 %v2759_v48  ;;  %1363 = vmatpush.msra.mxu3 %v2762_v49 }
 0x310   :  { %1304 = vmatpush.msrb.mxu0 %v2765_v50  ;;  %1324 = vmatpush.msra.mxu1 %v2768_v52 }
 0x311   :  { %1344 = vmatpush.msra.mxu2 %v2771_v53  ;;  %1364 = vmatpush.msra.mxu3 %v2774_v54 }
 0x312   :  { %1305 = vmatpush.msrb.mxu0 %v2777_v57  ;;  %1325 = vmatpush.msra.mxu1 %v2780_v4 }
 0x313   :  { %1345 = vmatpush.msra.mxu2 %v2783_v0  ;;  %1365 = vmatpush.msra.mxu3 %v2786_v51 }
 0x314   :  { %1306 = vmatpush.msrb.mxu0 %v2789_v45  ;;  %1326 = vmatpush.msra.mxu1 %v2792_v9 }
 0x315   :  { %1346 = vmatpush.msra.mxu2 %v2795_v32  ;;  %1366 = vmatpush.msra.mxu3 %v2798_v55 }
 0x316   :  { %1307 = vmatpush.msrb.mxu0 %v2801_v62  ;;  %1327 = vmatpush.msra.mxu1 %v2804_v63 }
 0x317   :  { %1347 = vmatpush.msra.mxu2 %v2807_v2  ;;  %1367 = vmatpush.msra.mxu3 %v2810_v59 }
 0x318   :  { %1308 = vmatpush.msrb.mxu0 %v2813_v19  ;;  %1328 = vmatpush.msra.mxu1 %v2816_v61 }
 0x319   :  { %1348 = vmatpush.msra.mxu2 %v2819_v5  ;;  %1368 = vmatpush.msra.mxu3 %v2822_v8 }
 0x31a   :  { %1309 = vmatpush.msrb.mxu0 %v2825_v1  ;;  %1329 = vmatpush.msra.mxu1 %v2828_v60 }
 0x31b   :  { %1349 = vmatpush.msra.mxu2 %v2831_v6  ;;  %1369 = vmatpush.msra.mxu3 %v2834_v58 }
 0x31c   :  { %1310 = vmatpush.msrb.mxu0 %v2837_v7  ;;  %1330 = vmatpush.msra.mxu1 %v2840_v3 }
 0x31d   :  { %1350 = vmatpush.msra.mxu2 %v3413_v18  ;;  %1370 = vmatpush.msra.mxu3 %v3414_v20 }
 0x31e   :  { %1311 = vmatpush.msrb.mxu0 %v3415_v10  ;;  %1331 = vmatpush.msra.mxu1 %v3416_v13 }
 0x31f   :  { %1351 = vmatpush.msra.mxu2 %v3417_v36  ;;  %1371 = vmatpush.msra.mxu3 %v3418_v34 }
 0x320   :  { %1312 = vmatpush.msrb.mxu0 %v3419_v30  ;;  %1332 = vmatpush.msra.mxu1 %v3420_v12 }
 0x321   :  { %1352 = vmatpush.msra.mxu2 %v3421_v33  ;;  %1372 = vmatpush.msra.mxu3 %v3422_v23 }
 0x322   :  { %1313 = vmatpush.msrb.mxu0 %v3423_v24  ;;  %1333 = vmatpush.msra.mxu1 %v3424_v29 }
 0x323   :  { %1353 = vmatpush.msra.mxu2 %v3425_v22  ;;  %1373 = vmatpush.msra.mxu3 %v3426_v21  ;;  %v3439_v21 = vld [vmem:[#allocation53_spill] sm:$0xff]  ;;  %v3440_v22 = vld [vmem:[#allocation56_spill] sm:$0xff] }
 0x324   :  { %1314 = vmatpush.msrb.mxu0 %v3427_v14  ;;  %1334 = vmatpush.msra.mxu1 %v3428_v31  ;;  %v3438_v14 = vld [vmem:[#allocation45_spill] sm:$0xff] }
 0x325   :  { %1354 = vmatpush.msra.mxu2 %v3429_v28  ;;  %1374 = vmatpush.msra.mxu3 %v3430_v17 }
 0x326   :  { %1315 = vmatpush.msrb.mxu0 %v3431_v26  ;;  %1335 = vmatpush.msra.mxu1 %v3432_v25 }
 0x327   :  { %1355 = vmatpush.msra.mxu2 %v3433_v16  ;;  %1375 = vmatpush.msra.mxu3 %v3434_v27  ;;  %v3441_v27 = vld [vmem:[#allocation57_spill] sm:$0xff] }
 0x328   :  { %1316 = vmatpush.msrb.mxu0 %v3435_v15  ;;  %1336 = vmatpush.msra.mxu1 %v3436_v37 }
 0x329   :  { %1356 = vmatpush.msra.mxu2 %v3437_v11  ;;  %1376 = vmatpush.msra.mxu3 %v3438_v14 }
 0x385   :  { %v1016_v31 = vpop.f32.mrf.mxu0  ;;  %v1036_v28 = vpop.f32.mrf.mxu1 }
 0x386   :  { %v1079_v17 = vadd.f32 %v1016_v31, %v3439_v21  ;;  %v1080_v26 = vadd.f32 %v1036_v28, %v3440_v22  ;;  %v3442_v22 = vld [vmem:[#allocation58_spill] sm:$0xff] }
 0x388   :  { %v1739_v29 = vmul.f32 -1.442695, %v1079_v17  ;;  %v1740_v25 = vmul.f32 -1.442695, %v1080_v26 }
 0x38a   :  { %1828 = vpow2.f32 %v1739_v29 }
 0x38b   :  { %1830 = vpow2.f32 %v1740_v25 }
 0x38c   :  { %v1056_v16 = vpop.f32.mrf.mxu2  ;;  %v1076_v14 = vpop.f32.mrf.mxu3 }
 0x38d   :  { %v1081_v24 = vadd.f32 %v1056_v16, %v3441_v27  ;;  %v1082_v28 = vadd.f32 %v1076_v14, %v3442_v22 }
 0x38f   :  { %v1741_v15 = vmul.f32 -1.442695, %v1081_v24 }
 0x390   :  { %v1829_v23 = vpop.eup %1828 }
 0x391   :  { %v1831_v37 = vpop.eup %1830  ;;  %v1092_v33 = vadd.f32 1.0, %v1829_v23  ;;  %1832 = vpow2.f32 %v1741_v15 }
 0x392   :  { %v1093_v11 = vadd.f32 1.0, %v1831_v37 }
 0x393   :  { %1834 = vrcp.f32 %v1092_v33  ;;  %v1106_v24 = vand.u32 2147483648, %v1092_v33  ;;  %v1104_v15 = vand.u32 2147483647, %v1092_v33  ;;  %vm1100_vm4 = vweird.f32 %v1092_v33 }
 0x394   :  { %1836 = vrcp.f32 %v1093_v11  ;;  %v1121_v27 = vand.u32 2147483648, %v1093_v11  ;;  %v1119_v30 = vand.u32 2147483647, %v1093_v11  ;;  %vm1115_vm5 = vweird.f32 %v1093_v11 }
 0x395   :  { %v1107_v22 = vor.u32 1.1754944e-38, %v1106_v24  ;;  %vm1105_vm8 = vcmp.eq.f32.partialorder %v1104_v15, 8.507059e+37 }
 0x396   :  { %vm1120_vm9 = vcmp.eq.f32.partialorder %v1119_v30, 8.507059e+37 }
 0x397   :  { %v1833_v12 = vpop.eup %1832 }
 0x398   :  { %v1094_v21 = vadd.f32 1.0, %v1833_v12 }
 0x399   :  { %v1835_v31 = vpop.eup %1834 }
 0x39a   :  { %v1837_v17 = vpop.eup %1836  ;;  %v1096_v29 = vmul.f32 %v1835_v31, %v1092_v33  ;;  %1838 = vrcp.f32 %v1094_v21  ;;  %vm1101_vm2 = vweird.f32 %v1835_v31  ;;  %v1136_v24 = vand.u32 2147483648, %v1094_v21 }
 0x39b   :  { %v1111_v26 = vmul.f32 %v1837_v17, %v1093_v11  ;;  %1840 = vtanh.f32 %v1082_v28  ;;  %vm1116_vm3 = vweird.f32 %v1837_v17  ;;  %vm1102_vm6 = vmor %vm1100_vm4, %vm1101_vm2  ;;  %vm1130_vm11 = vweird.f32 %v1094_v21 }
 0x39c   :  { %v1097_v25 = vsub.f32 1.0, %v1096_v29  ;;  %vm1117_vm7 = vmor %vm1115_vm5, %vm1116_vm3  ;;  %v1122_v29 = vor.u32 1.1754944e-38, %v1121_v27  ;;  %v1137_v15 = vor.u32 1.1754944e-38, %v1136_v24 }
 0x39d   :  { %v1112_v16 = vsub.f32 1.0, %v1111_v26 }
 0x39e   :  { %v1098_v23 = vmul.f32 %v1835_v31, %v1097_v25 }
 0x39f   :  { %v1113_v37 = vmul.f32 %v1837_v17, %v1112_v16 }
 0x3a0   :  { %v1839_v34 = vpop.eup %1838  ;;  %v1099_v12 = vadd.f32 %v1835_v31, %v1098_v23 }
 0x3a1   :  { %v1126_v14 = vmul.f32 %v1839_v34, %v1094_v21  ;;  %v1114_v36 = vadd.f32 %v1837_v17, %v1113_v37  ;;  %v1841_v28 = vpop.eup %1840  ;;  %vm1131_vm10 = vweird.f32 %v1839_v34 }
 0x3a2   :  { %v1103_v26 = vsel %vm1102_vm6, %v1835_v31, %v1099_v12  ;;  %v1134_v31 = vand.u32 2147483647, %v1094_v21  ;;  %vm1132_vm12 = vmor %vm1130_vm11, %vm1131_vm10  ;;  %v3472_v12 = vld [vmem:[#allocation61_spill] sm:$0xff] }
 0x3a3   :  { %v1127_v13 = vsub.f32 1.0, %v1126_v14  ;;  %v1108_v25 = vsel %vm1105_vm8, %v1107_v22, %v1103_v26  ;;  %v1118_v10 = vsel %vm1117_vm7, %v1837_v17, %v1114_v36 }
 0x3a4   :  { %v1123_v16 = vsel %vm1120_vm9, %v1122_v29, %v1118_v10  ;;  %v1142_v20 = vmul.f32 %v1841_v28, %v1108_v25  ;;  %vm1135_vm13 = vcmp.eq.f32.partialorder %v1134_v31, 8.507059e+37 }
 0x3a5   :  { %v1141_v18 = vmul.f32 %v1123_v16, %v2998_v35  ;;  %v1128_v23 = vmul.f32 %v1839_v34, %v1127_v13 }
 0x3a7   :  { %v3070_v33 = vadd.f32 %v1142_v20, %v1141_v18  ;;  %v1129_v11 = vadd.f32 %v1839_v34, %v1128_v23 }
 0x3a9   :  { %1842 = vtanh.f32 %v3070_v33  ;;  %v1133_v27 = vsel %vm1132_vm12, %v1839_v34, %v1129_v11 }
 0x3aa   :  { %v1138_v30 = vsel %vm1135_vm13, %v1137_v15, %v1133_v27 }
 0x3af   :  { %v1843_v36 = vpop.eup %1842 }
 0x3b0   :  { %v1145_v10 = vmul.f32 %v1843_v36, %v1138_v30 }
 0x3b2   :  { %1166 = vmatmul.f32.vlgmr.msra.gmra.mxu0 %v1145_v10  ;;  %1186 = vmatmul.f32.vlgmr.msrb.gmra.mxu1 %v1145_v10 }
 0x3b3   :  { %1206 = vmatmul.f32.vlgmr.msrb.gmra.mxu2 %v1145_v10  ;;  %1226 = vmatmul.f32.vlgmr.msrb.gmra.mxu3 %v1145_v10 }
 0x3b4   :  { %1452 = vmatpush.msra.mxu0 %v2729_v56  ;;  %1472 = vmatpush.msrb.mxu1 %v2732_v38  ;;  %v3443_v56 = vld [vmem:[#allocation17_spill] sm:$0xff]  ;;  %v3444_v38 = vld [vmem:[#allocation16_spill] sm:$0xff] }
 0x3b5   :  { %1492 = vmatpush.msrb.mxu2 %v2735_v39  ;;  %1512 = vmatpush.msrb.mxu3 %v2738_v40  ;;  %v3445_v39 = vld [vmem:[#allocation19_spill] sm:$0xff]  ;;  %v3446_v40 = vld [vmem:[#allocation20_spill] sm:$0xff] }
 0x3b6   :  { %1453 = vmatpush.msra.mxu0 %v2741_v41  ;;  %1473 = vmatpush.msrb.mxu1 %v2744_v42  ;;  %v3447_v41 = vld [vmem:[#allocation21_spill] sm:$0xff]  ;;  %v3448_v42 = vld [vmem:[#allocation18_spill] sm:$0xff] }
 0x3b7   :  { %1493 = vmatpush.msrb.mxu2 %v2747_v43  ;;  %1513 = vmatpush.msrb.mxu3 %v2750_v44  ;;  %v3449_v43 = vld [vmem:[#allocation24_spill] sm:$0xff]  ;;  %v3450_v44 = vld [vmem:[#allocation26_spill] sm:$0xff] }
 0x3b8   :  { %1454 = vmatpush.msra.mxu0 %v2753_v46  ;;  %1474 = vmatpush.msrb.mxu1 %v2756_v47  ;;  %v3451_v46 = vld [vmem:[#allocation22_spill] sm:$0xff]  ;;  %v3452_v47 = vld [vmem:[#allocation23_spill] sm:$0xff] }
 0x3b9   :  { %1494 = vmatpush.msrb.mxu2 %v2759_v48  ;;  %1514 = vmatpush.msrb.mxu3 %v2762_v49  ;;  %v3453_v48 = vld [vmem:[#allocation28_spill] sm:$0xff]  ;;  %v3454_v49 = vld [vmem:[#allocation30_spill] sm:$0xff] }
 0x3ba   :  { %1455 = vmatpush.msra.mxu0 %v2765_v50  ;;  %1475 = vmatpush.msrb.mxu1 %v2768_v52  ;;  %v3455_v50 = vld [vmem:[#allocation25_spill] sm:$0xff]  ;;  %v3456_v52 = vld [vmem:[#allocation36_spill] sm:$0xff] }
 0x3bb   :  { %1495 = vmatpush.msrb.mxu2 %v2771_v53  ;;  %1515 = vmatpush.msrb.mxu3 %v2774_v54  ;;  %v3457_v53 = vld [vmem:[#allocation27_spill] sm:$0xff]  ;;  %v3458_v54 = vld [vmem:[#allocation32_spill] sm:$0xff] }
 0x3bc   :  { %1456 = vmatpush.msra.mxu0 %v2777_v57  ;;  %1476 = vmatpush.msrb.mxu1 %v2780_v4  ;;  %v3459_v57 = vld [vmem:[#allocation37_spill] sm:$0xff] }
 0x3bd   :  { %1496 = vmatpush.msrb.mxu2 %v2783_v0  ;;  %1516 = vmatpush.msrb.mxu3 %v2786_v51  ;;  %v3460_v4 = vld [vmem:[#allocation33_spill] sm:$0xff]  ;;  %v3461_v0 = vld [vmem:[#allocation35_spill] sm:$0xff] }
 0x3be   :  { %1457 = vmatpush.msra.mxu0 %v2789_v45  ;;  %1477 = vmatpush.msrb.mxu1 %v2792_v9  ;;  %v3462_v51 = vld [vmem:[#allocation29_spill] sm:$0xff]  ;;  %v3463_v45 = vld [vmem:[#allocation34_spill] sm:$0xff] }
 0x3bf   :  { %1497 = vmatpush.msrb.mxu2 %v2795_v32  ;;  %1517 = vmatpush.msrb.mxu3 %v2798_v55  ;;  %v3464_v9 = vld [vmem:[#allocation38_spill] sm:$0xff]  ;;  %v3465_v32 = vld [vmem:[#allocation31_spill] sm:$0xff] }
 0x3c0   :  { %1458 = vmatpush.msra.mxu0 %v2801_v62  ;;  %1478 = vmatpush.msrb.mxu1 %v2804_v63  ;;  %v3466_v55 = vld [vmem:[#allocation39_spill] sm:$0xff]  ;;  %v3468_v63 = vld [vmem:[#allocation45_spill] sm:$0xff] }
 0x3c1   :  { %1498 = vmatpush.msrb.mxu2 %v2807_v2  ;;  %1518 = vmatpush.msrb.mxu3 %v2810_v59  ;;  %v3467_v62 = vld [vmem:[#allocation43_spill] sm:$0xff] }
 0x3c2   :  { %1459 = vmatpush.msra.mxu0 %v2813_v19  ;;  %1479 = vmatpush.msrb.mxu1 %v2816_v61  ;;  %v3469_v19 = vld [vmem:[#allocation40_spill] sm:$0xff] }
 0x3c3   :  { %1499 = vmatpush.msrb.mxu2 %v2819_v5  ;;  %1519 = vmatpush.msrb.mxu3 %v2822_v8  ;;  %v3470_v5 = vld [vmem:[#allocation59_spill] sm:$0xff] }
 0x3c4   :  { %1460 = vmatpush.msra.mxu0 %v2825_v1  ;;  %1480 = vmatpush.msrb.mxu1 %v2828_v60 }
 0x3c5   :  { %1500 = vmatpush.msrb.mxu2 %v2831_v6  ;;  %1520 = vmatpush.msrb.mxu3 %v2834_v58  ;;  %v3471_v58 = vld [vmem:[#allocation60_spill] sm:$0xff] }
 0x3c6   :  { %1461 = vmatpush.msra.mxu0 %v2837_v7  ;;  %1481 = vmatpush.msrb.mxu1 %v2840_v3 }
 0x3c7   :  { %1501 = vmatpush.msrb.mxu2 %v3443_v56  ;;  %1521 = vmatpush.msrb.mxu3 %v3444_v38 }
 0x3c8   :  { %1462 = vmatpush.msra.mxu0 %v3445_v39  ;;  %1482 = vmatpush.msrb.mxu1 %v3446_v40 }
 0x3c9   :  { %1502 = vmatpush.msrb.mxu2 %v3447_v41  ;;  %1522 = vmatpush.msrb.mxu3 %v3448_v42 }
 0x3ca   :  { %1463 = vmatpush.msra.mxu0 %v3449_v43  ;;  %1483 = vmatpush.msrb.mxu1 %v3450_v44 }
 0x3cb   :  { %1503 = vmatpush.msrb.mxu2 %v3451_v46  ;;  %1523 = vmatpush.msrb.mxu3 %v3452_v47 }
 0x3cc   :  { %1464 = vmatpush.msra.mxu0 %v3453_v48  ;;  %1484 = vmatpush.msrb.mxu1 %v3454_v49 }
 0x3cd   :  { %1504 = vmatpush.msrb.mxu2 %v3455_v50  ;;  %1524 = vmatpush.msrb.mxu3 %v3456_v52 }
 0x3ce   :  { %1465 = vmatpush.msra.mxu0 %v3457_v53  ;;  %1485 = vmatpush.msrb.mxu1 %v3458_v54 }
 0x3cf   :  { %1505 = vmatpush.msrb.mxu2 %v3459_v57  ;;  %1525 = vmatpush.msrb.mxu3 %v3460_v4 }
 0x3d0   :  { %1466 = vmatpush.msra.mxu0 %v3461_v0  ;;  %1486 = vmatpush.msrb.mxu1 %v3462_v51 }
 0x3d1   :  { %1506 = vmatpush.msrb.mxu2 %v3463_v45  ;;  %1526 = vmatpush.msrb.mxu3 %v3464_v9  ;;  %v3473_v9 = vld [vmem:[#allocation41_spill] sm:$0xff] }
 0x3d2   :  { %1467 = vmatpush.msra.mxu0 %v3465_v32  ;;  %1487 = vmatpush.msrb.mxu1 %v3466_v55  ;;  %v3474_v55 = vld [vmem:[#allocation62_spill] sm:$0xff] }
 0x3d3   :  { %1507 = vmatpush.msrb.mxu2 %v3467_v62  ;;  %1527 = vmatpush.msrb.mxu3 %v3468_v63 }
 0x42f   :  { %v1167_v2 = vpop.f32.mrf.mxu0  ;;  %v1187_v59 = vpop.f32.mrf.mxu1 }
 0x430   :  { %v1230_v61 = vadd.f32 %v1167_v2, %v3469_v19  ;;  %v1231_v8 = vadd.f32 %v1187_v59, %v3470_v5  ;;  %v3475_v19 = vld [vmem:[#allocation63_spill] sm:$0xff] }
 0x432   :  { %v1742_v1 = vmul.f32 -1.442695, %v1230_v61  ;;  %v1743_v60 = vmul.f32 -1.442695, %v1231_v8 }
 0x434   :  { %1844 = vpow2.f32 %v1742_v1 }
 0x435   :  { %1846 = vpow2.f32 %v1743_v60 }
 0x436   :  { %v1207_v6 = vpop.f32.mrf.mxu2  ;;  %v1227_v34 = vpop.f32.mrf.mxu3 }
 0x437   :  { %v1232_v7 = vadd.f32 %v1207_v6, %v3471_v58  ;;  %v1233_v14 = vadd.f32 %v1227_v34, %v3472_v12 }
 0x439   :  { %v1744_v3 = vmul.f32 -1.442695, %v1232_v7 }
 0x43a   :  { %v1845_v35 = vpop.eup %1844 }
 0x43b   :  { %v1847_v18 = vpop.eup %1846  ;;  %v1243_v20 = vadd.f32 1.0, %v1845_v35  ;;  %1848 = vpow2.f32 %v1744_v3 }
 0x43c   :  { %v1244_v13 = vadd.f32 1.0, %v1847_v18  ;;  %v3476_v18 = vld [vmem:[#allocation64_spill] sm:$0xff] }
 0x43d   :  { %1850 = vrcp.f32 %v1243_v20  ;;  %v1257_v16 = vand.u32 2147483648, %v1243_v20  ;;  %v1255_v24 = vand.u32 2147483647, %v1243_v20  ;;  %vm1251_vm0 = vweird.f32 %v1243_v20 }
 0x43e   :  { %1852 = vrcp.f32 %v1244_v13  ;;  %v1272_v23 = vand.u32 2147483648, %v1244_v13  ;;  %v1270_v27 = vand.u32 2147483647, %v1244_v13  ;;  %vm1266_vm1 = vweird.f32 %v1244_v13 }
 0x43f   :  { %v1258_v10 = vor.u32 1.1754944e-38, %v1257_v16  ;;  %vm1256_vm4 = vcmp.eq.f32.partialorder %v1255_v24, 8.507059e+37 }
 0x440   :  { %v1273_v38 = vor.u32 1.1754944e-38, %v1272_v23  ;;  %vm1271_vm5 = vcmp.eq.f32.partialorder %v1270_v27, 8.507059e+37 }
 0x441   :  { %v1849_v21 = vpop.eup %1848 }
 0x442   :  { %v1245_v17 = vadd.f32 1.0, %v1849_v21 }
 0x443   :  { %v1851_v37 = vpop.eup %1850 }
 0x444   :  { %v1853_v22 = vpop.eup %1852  ;;  %v1247_v29 = vmul.f32 %v1851_v37, %v1243_v20  ;;  %1854 = vrcp.f32 %v1245_v17  ;;  %vm1252_vm14 = vweird.f32 %v1851_v37  ;;  %v1287_v52 = vand.u32 2147483648, %v1245_v17 }
 0x445   :  { %v1262_v26 = vmul.f32 %v1853_v22, %v1244_v13  ;;  %1856 = vtanh.f32 %v1233_v14  ;;  %vm1267_vm15 = vweird.f32 %v1853_v22  ;;  %vm1253_vm2 = vmor %vm1251_vm0, %vm1252_vm14  ;;  %vm1281_vm7 = vweird.f32 %v1245_v17 }
 0x446   :  { %v1248_v28 = vsub.f32 1.0, %v1247_v29  ;;  %vm1268_vm3 = vmor %vm1266_vm1, %vm1267_vm15  ;;  %v1285_v53 = vand.u32 2147483647, %v1245_v17  ;;  %v1288_v57 = vor.u32 1.1754944e-38, %v1287_v52 }
 0x447   :  { %v1263_v25 = vsub.f32 1.0, %v1262_v26 }
 0x448   :  { %v1249_v11 = vmul.f32 %v1851_v37, %v1248_v28  ;;  %vm1286_vm9 = vcmp.eq.f32.partialorder %v1285_v53, 8.507059e+37  ;;  %v1615_v53 = vld [vmem:[#allocation6 + $0x70] sm:$0xff] }
 0x449   :  { %v1264_v31 = vmul.f32 %v1853_v22, %v1263_v25 }
 0x44a   :  { %v1855_v15 = vpop.eup %1854  ;;  %v1250_v36 = vadd.f32 %v1851_v37, %v1249_v11 }
 0x44b   :  { %v1277_v30 = vmul.f32 %v1855_v15, %v1245_v17  ;;  %v1265_v56 = vadd.f32 %v1853_v22, %v1264_v31  ;;  %v1857_v40 = vpop.eup %1856  ;;  %vm1282_vm6 = vweird.f32 %v1855_v15 }
 0x44c   :  { %v1254_v39 = vsel %vm1253_vm2, %v1851_v37, %v1250_v36  ;;  %vm1283_vm8 = vmor %vm1281_vm7, %vm1282_vm6 }
 0x44d   :  { %v1278_v41 = vsub.f32 1.0, %v1277_v30  ;;  %v1259_v42 = vsel %vm1256_vm4, %v1258_v10, %v1254_v39  ;;  %v1269_v43 = vsel %vm1268_vm3, %v1853_v22, %v1265_v56 }
 0x44e   :  { %v1274_v44 = vsel %vm1271_vm5, %v1273_v38, %v1269_v43  ;;  %v1293_v46 = vmul.f32 %v1857_v40, %v1259_v42 }
 0x44f   :  { %v1292_v47 = vmul.f32 %v1274_v44, %v3070_v33  ;;  %v1279_v48 = vmul.f32 %v1855_v15, %v1278_v41 }
 0x451   :  { %v3142_v49 = vadd.f32 %v1293_v46, %v1292_v47  ;;  %v1280_v50 = vadd.f32 %v1855_v15, %v1279_v48 }
 0x453   :  { %1858 = vtanh.f32 %v3142_v49  ;;  %v1284_v54 = vsel %vm1283_vm8, %v1855_v15, %v1280_v50 }
 0x454   :  { %v1289_v0 = vsel %vm1286_vm9, %v1288_v57, %v1284_v54  ;;  %v1614_v54 = vld [vmem:[#allocation6 + $0x68] sm:$0xff]  ;;  %v1613_v57 = vld [vmem:[#allocation6 + $0x60] sm:$0xff] }
 0x459   :  { %v1859_v4 = vpop.eup %1858 }
 0x45a   :  { %v1296_v51 = vmul.f32 %v1859_v4, %v1289_v0  ;;  %v1612_v4 = vld [vmem:[#allocation6 + $0x58] sm:$0xff]  ;;  %v1611_v0 = vld [vmem:[#allocation6 + $0x50] sm:$0xff] }
 0x45c   :  { %1317 = vmatmul.f32.vlgmr.msrb.gmra.mxu0 %v1296_v51  ;;  %1337 = vmatmul.f32.vlgmr.msra.gmra.mxu1 %v1296_v51 }
 0x45d   :  { %1357 = vmatmul.f32.vlgmr.msra.gmra.mxu2 %v1296_v51  ;;  %1377 = vmatmul.f32.vlgmr.msra.gmra.mxu3 %v1296_v51  ;;  %v1610_v51 = vld [vmem:[#allocation6 + $0x48] sm:$0xff] }
 0x4d9   :  { %v1318_v33 = vpop.f32.mrf.mxu0  ;;  %v1338_v45 = vpop.f32.mrf.mxu1 }
 0x4da   :  { %v1381_v32 = vadd.f32 %v1318_v33, %v3473_v9  ;;  %v1382_v62 = vadd.f32 %v1338_v45, %v3474_v55  ;;  %v1609_v33 = vld [vmem:[#allocation6 + $0x40] sm:$0xff]  ;;  %v1608_v45 = vld [vmem:[#allocation6 + $0x38] sm:$0xff]  ;;  %v1607_v9 = vld [vmem:[#allocation6 + $0x30] sm:$0xff] }
 0x4dc   :  { %v1745_v63 = vmul.f32 -1.442695, %v1381_v32  ;;  %v1746_v2 = vmul.f32 -1.442695, %v1382_v62  ;;  %v3477_v62 = vld [vmem:[#allocation42_spill] sm:$0xff] }
 0x4de   :  { %1860 = vpow2.f32 %v1745_v63 }
 0x4df   :  { %1862 = vpow2.f32 %v1746_v2  ;;  %v3478_v2 = vld [vmem:[#allocation65_spill] sm:$0xff] }
 0x4e0   :  { %v1358_v59 = vpop.f32.mrf.mxu2  ;;  %v1378_v58 = vpop.f32.mrf.mxu3 }
 0x4e1   :  { %v1383_v61 = vadd.f32 %v1358_v59, %v3475_v19  ;;  %v1384_v20 = vadd.f32 %v1378_v58, %v3476_v18  ;;  %v1606_v19 = vld [vmem:[#allocation6 + $0x28] sm:$0xff] }
 0x4e2   :  { %v1602_v58 = vld [vmem:[#allocation6 + $0x8] sm:$0xff] }
 0x4e3   :  { %v1747_v5 = vmul.f32 -1.442695, %v1383_v61 }
 0x4e4   :  { %v1861_v8 = vpop.eup %1860 }
 0x4e5   :  { %v1863_v1 = vpop.eup %1862  ;;  %v1394_v60 = vadd.f32 1.0, %v1861_v8  ;;  %1864 = vpow2.f32 %v1747_v5  ;;  %v1605_v8 = vld [vmem:[#allocation6 + $0x20] sm:$0xff] }
 0x4e6   :  { %v1395_v6 = vadd.f32 1.0, %v1863_v1  ;;  %v1604_v1 = vld [vmem:[#allocation6 + $0x18] sm:$0xff] }
 0x4e7   :  { %1866 = vrcp.f32 %v1394_v60  ;;  %v1408_v12 = vand.u32 2147483648, %v1394_v60  ;;  %v1406_v29 = vand.u32 2147483647, %v1394_v60  ;;  %vm1402_vm12 = vweird.f32 %v1394_v60 }
 0x4e8   :  { %1868 = vrcp.f32 %v1395_v6  ;;  %v1423_v14 = vand.u32 2147483648, %v1395_v6  ;;  %v1421_v28 = vand.u32 2147483647, %v1395_v6  ;;  %vm1417_vm13 = vweird.f32 %v1395_v6 }
 0x4e9   :  { %v1409_v11 = vor.u32 1.1754944e-38, %v1408_v12  ;;  %vm1407_vm0 = vcmp.eq.f32.partialorder %v1406_v29, 8.507059e+37 }
 0x4ea   :  { %v1424_v31 = vor.u32 1.1754944e-38, %v1423_v14  ;;  %vm1422_vm1 = vcmp.eq.f32.partialorder %v1421_v28, 8.507059e+37 }
 0x4eb   :  { %v1865_v7 = vpop.eup %1864 }
 0x4ec   :  { %v1396_v3 = vadd.f32 1.0, %v1865_v7  ;;  %v3479_v7 = vld [vmem:[#allocation66_spill] sm:$0xff] }
 0x4ed   :  { %v1867_v35 = vpop.eup %1866 }
 0x4ee   :  { %v1869_v13 = vpop.eup %1868  ;;  %v1398_v34 = vmul.f32 %v1867_v35, %v1394_v60  ;;  %1870 = vrcp.f32 %v1396_v3  ;;  %vm1403_vm10 = vweird.f32 %v1867_v35  ;;  %v1438_v43 = vand.u32 2147483648, %v1396_v3  ;;  %v1603_v60 = vld [vmem:[#allocation6 + $0x10] sm:$0xff] }
 0x4ef   :  { %v1413_v21 = vmul.f32 %v1869_v13, %v1395_v6  ;;  %1872 = vtanh.f32 %v1384_v20  ;;  %vm1418_vm11 = vweird.f32 %v1869_v13  ;;  %vm1404_vm14 = vmor %vm1402_vm12, %vm1403_vm10  ;;  %vm1432_vm3 = vweird.f32 %v1396_v3 }
 0x4f0   :  { %v1399_v17 = vsub.f32 1.0, %v1398_v34  ;;  %vm1419_vm15 = vmor %vm1417_vm13, %vm1418_vm11  ;;  %v1436_v44 = vand.u32 2147483647, %v1396_v3  ;;  %v1439_v47 = vor.u32 1.1754944e-38, %v1438_v43 }
 0x4f1   :  { %v1414_v37 = vsub.f32 1.0, %v1413_v21 }
 0x4f2   :  { %v1400_v22 = vmul.f32 %v1867_v35, %v1399_v17  ;;  %vm1437_vm5 = vcmp.eq.f32.partialorder %v1436_v44, 8.507059e+37 }
 0x4f3   :  { %v1415_v26 = vmul.f32 %v1869_v13, %v1414_v37 }
 0x4f4   :  { %v1871_v25 = vpop.eup %1870  ;;  %v1401_v16 = vadd.f32 %v1867_v35, %v1400_v22  ;;  %v3480_v22 = vld [vmem:[#allocation67_spill] sm:$0xff] }
 0x4f5   :  { %v1428_v23 = vmul.f32 %v1871_v25, %v1396_v3  ;;  %v1416_v24 = vadd.f32 %v1869_v13, %v1415_v26  ;;  %v1873_v15 = vpop.eup %1872  ;;  %vm1433_vm2 = vweird.f32 %v1871_v25 }
 0x4f6   :  { %v1405_v27 = vsel %vm1404_vm14, %v1867_v35, %v1401_v16  ;;  %vm1434_vm4 = vmor %vm1432_vm3, %vm1433_vm2  ;;  %v1601_v35 = vld [vmem:[#allocation6] sm:$0xff] }
 0x4f7   :  { %v1429_v36 = vsub.f32 1.0, %v1428_v23  ;;  %v1410_v30 = vsel %vm1407_vm0, %v1409_v11, %v1405_v27  ;;  %v1420_v10 = vsel %vm1419_vm15, %v1869_v13, %v1416_v24 }
 0x4f8   :  { %v1425_v56 = vsel %vm1422_vm1, %v1424_v31, %v1420_v10  ;;  %v1444_v38 = vmul.f32 %v1873_v15, %v1410_v30 }
 0x4f9   :  { %v1443_v39 = vmul.f32 %v1425_v56, %v3142_v49  ;;  %v1430_v40 = vmul.f32 %v1871_v25, %v1429_v36  ;;  %v1616_v49 = vld [vmem:[#allocation6 + $0x78] sm:$0xff] }
 0x4fa   :  { %1621 = vmatpush.msrb.mxu0 %v1616_v49 }
 0x4fb   :  { %v3150_v41 = vadd.f32 %v1444_v38, %v1443_v39  ;;  %v1431_v42 = vadd.f32 %v1871_v25, %v1430_v40 }
 0x4fc   :  { %1622 = vmatpush.msrb.mxu0 %v1615_v53 }
 0x4fd   :  { %1874 = vtanh.f32 %v3150_v41  ;;  %v1435_v46 = vsel %vm1434_vm4, %v1871_v25, %v1431_v42 }
 0x4fe   :  { %v1440_v50 = vsel %vm1437_vm5, %v1439_v47, %v1435_v46  ;;  %1623 = vmatpush.msrb.mxu0 %v1614_v54 }
 0x500   :  { %1624 = vmatpush.msrb.mxu0 %v1613_v57 }
 0x502   :  { %1625 = vmatpush.msrb.mxu0 %v1612_v4 }
 0x503   :  { %v1875_v48 = vpop.eup %1874 }
 0x504   :  { %v1447_v52 = vmul.f32 %v1875_v48, %v1440_v50  ;;  %1626 = vmatpush.msrb.mxu0 %v1611_v0 }
 0x506   :  { %1468 = vmatmul.f32.vlgmr.msra.gmra.mxu0 %v1447_v52  ;;  %1488 = vmatmul.f32.vlgmr.msrb.gmra.mxu1 %v1447_v52 }
 0x507   :  { %1508 = vmatmul.f32.vlgmr.msrb.gmra.mxu2 %v1447_v52  ;;  %1528 = vmatmul.f32.vlgmr.msrb.gmra.mxu3 %v1447_v52 }
 0x508   :  { %1627 = vmatpush.msrb.mxu0 %v1610_v51 }
 0x50a   :  { %1628 = vmatpush.msrb.mxu0 %v1609_v33 }
 0x50c   :  { %1629 = vmatpush.msrb.mxu0 %v1608_v45 }
 0x50e   :  { %1630 = vmatpush.msrb.mxu0 %v1607_v9 }
 0x510   :  { %1631 = vmatpush.msrb.mxu0 %v1606_v19 }
 0x512   :  { %1632 = vmatpush.msrb.mxu0 %v1605_v8 }
 0x514   :  { %1633 = vmatpush.msrb.mxu0 %v1604_v1 }
 0x516   :  { %1634 = vmatpush.msrb.mxu0 %v1603_v60 }
 0x518   :  { %1635 = vmatpush.msrb.mxu0 %v1602_v58 }
 0x51a   :  { %1636 = vmatpush.msrb.mxu0 %v1601_v35 }
 0x583   :  { %v1469_v32 = vpop.f32.mrf.mxu0  ;;  %v1489_v55 = vpop.f32.mrf.mxu1 }
 0x584   :  { %v1532_v63 = vadd.f32 %v1469_v32, %v3477_v62  ;;  %v1533_v59 = vadd.f32 %v1489_v55, %v3478_v2 }
 0x586   :  { %v1748_v61 = vmul.f32 -1.442695, %v1532_v63  ;;  %v1749_v5 = vmul.f32 -1.442695, %v1533_v59 }
 0x588   :  { %1876 = vpow2.f32 %v1748_v61 }
 0x589   :  { %1878 = vpow2.f32 %v1749_v5 }
 0x58a   :  { %v1509_v6 = vpop.f32.mrf.mxu2  ;;  %v1529_v17 = vpop.f32.mrf.mxu3 }
 0x58b   :  { %v1534_v3 = vadd.f32 %v1509_v6, %v3479_v7  ;;  %v1535_v29 = vadd.f32 %v1529_v17, %v3480_v22 }
 0x58d   :  { %v1750_v18 = vmul.f32 -1.442695, %v1534_v3 }
 0x58e   :  { %v1877_v20 = vpop.eup %1876 }
 0x58f   :  { %v1879_v13 = vpop.eup %1878  ;;  %v1545_v34 = vadd.f32 1.0, %v1877_v20  ;;  %1880 = vpow2.f32 %v1750_v18 }
 0x590   :  { %v1546_v21 = vadd.f32 1.0, %v1879_v13 }
 0x591   :  { %1882 = vrcp.f32 %v1545_v34  ;;  %v1559_v11 = vand.u32 2147483648, %v1545_v34  ;;  %v1557_v27 = vand.u32 2147483647, %v1545_v34  ;;  %vm1553_vm8 = vweird.f32 %v1545_v34 }
 0x592   :  { %1884 = vrcp.f32 %v1546_v21  ;;  %v1574_v24 = vand.u32 2147483648, %v1546_v21  ;;  %v1572_v36 = vand.u32 2147483647, %v1546_v21  ;;  %vm1568_vm9 = vweird.f32 %v1546_v21 }
 0x593   :  { %v1560_v38 = vor.u32 1.1754944e-38, %v1559_v11  ;;  %vm1558_vm12 = vcmp.eq.f32.partialorder %v1557_v27, 8.507059e+37 }
 0x594   :  { %v1575_v40 = vor.u32 1.1754944e-38, %v1574_v24  ;;  %vm1573_vm13 = vcmp.eq.f32.partialorder %v1572_v36, 8.507059e+37 }
 0x595   :  { %v1881_v37 = vpop.eup %1880 }
 0x596   :  { %v1547_v12 = vadd.f32 1.0, %v1881_v37 }
 0x597   :  { %v1883_v14 = vpop.eup %1882 }
 0x598   :  { %v1885_v26 = vpop.eup %1884  ;;  %v1549_v28 = vmul.f32 %v1883_v14, %v1545_v34  ;;  %1886 = vrcp.f32 %v1547_v12  ;;  %vm1554_vm6 = vweird.f32 %v1883_v14  ;;  %v1589_v57 = vand.u32 2147483648, %v1547_v12 }
 0x599   :  { %v1564_v25 = vmul.f32 %v1885_v26, %v1546_v21  ;;  %1888 = vtanh.f32 %v1535_v29  ;;  %vm1569_vm7 = vweird.f32 %v1885_v26  ;;  %vm1555_vm10 = vmor %vm1553_vm8, %vm1554_vm6  ;;  %vm1583_vm15 = vweird.f32 %v1547_v12 }
 0x59a   :  { %v1550_v16 = vsub.f32 1.0, %v1549_v28  ;;  %vm1570_vm11 = vmor %vm1568_vm9, %vm1569_vm7  ;;  %v1587_v4 = vand.u32 2147483647, %v1547_v12  ;;  %v1590_v51 = vor.u32 1.1754944e-38, %v1589_v57 }
 0x59b   :  { %v1565_v23 = vsub.f32 1.0, %v1564_v25 }
 0x59c   :  { %v1551_v31 = vmul.f32 %v1883_v14, %v1550_v16  ;;  %vm1588_vm1 = vcmp.eq.f32.partialorder %v1587_v4, 8.507059e+37 }
 0x59d   :  { %v1566_v15 = vmul.f32 %v1885_v26, %v1565_v23 }
 0x59e   :  { %v1887_v30 = vpop.eup %1886  ;;  %v1552_v10 = vadd.f32 %v1883_v14, %v1551_v31 }
 0x59f   :  { %v1579_v56 = vmul.f32 %v1887_v30, %v1547_v12  ;;  %v1567_v39 = vadd.f32 %v1885_v26, %v1566_v15  ;;  %v1889_v43 = vpop.eup %1888  ;;  %vm1584_vm14 = vweird.f32 %v1887_v30 }
 0x5a0   :  { %v1556_v42 = vsel %vm1555_vm10, %v1883_v14, %v1552_v10  ;;  %vm1585_vm0 = vmor %vm1583_vm15, %vm1584_vm14 }
 0x5a1   :  { %v1580_v44 = vsub.f32 1.0, %v1579_v56  ;;  %v1561_v46 = vsel %vm1558_vm12, %v1560_v38, %v1556_v42  ;;  %v1571_v47 = vsel %vm1570_vm11, %v1885_v26, %v1567_v39 }
 0x5a2   :  { %v1576_v48 = vsel %vm1573_vm13, %v1575_v40, %v1571_v47  ;;  %v1595_v50 = vmul.f32 %v1889_v43, %v1561_v46 }
 0x5a3   :  { %v1594_v52 = vmul.f32 %v1576_v48, %v3150_v41  ;;  %v1581_v49 = vmul.f32 %v1887_v30, %v1580_v44  ;;  %v1763_v41 = vld [vmem:[%s3177_s7] ss:$0 sm:$0xff] }
 0x5a5   :  { %v1596_v53 = vadd.f32 %v1595_v50, %v1594_v52  ;;  %v1582_v54 = vadd.f32 %v1887_v30, %v1581_v49 }
 0x5a7   :  { %1890 = vtanh.f32 %v1596_v53  ;;  %1600 = vst [vmem:[#allocation11] sm:$0xff] %v1596_v53  ;;  %v1586_v0 = vsel %vm1585_vm0, %v1887_v30, %v1582_v54 }
 0x5a8   :  { %v1591_v45 = vsel %vm1588_vm1, %v1590_v51, %v1586_v0 }
 0x5ad   :  { %v1891_v33 = vpop.eup %1890 }
 0x5ae   :  { %v1598_v9 = vmul.f32 %v1891_v33, %v1591_v45 }
 0x5b0   :  { %1637 = vmatmul.f32.vlgmr.msrb.gmra.mxu0 %v1598_v9  ;;  %1599 = vst [vmem:[#allocation9] sm:$0xff] %v1598_v9 }
 0x5b1   :  { %1663 = dma.vmem_to_hbm [thread:$0]  %s1659_s4, 128, %s1661_s28, [#allocation10]  }
 0x5b2   :  { %1674 = dma.vmem_to_hbm [thread:$0]  %s1670_s30, 128, %s1672_s13, [#allocation10]  }
 0x62d   :  { %v1638_v32 = vpop.f32.mrf.mxu0 }
 0x62e   :  { %v1639_v55 = vadd.f32 %v1763_v41, %v1638_v32 }
 0x630   :  { %1641 = vst [vmem:[#allocation8] sm:$0xff] %v1639_v55 }
 0x631   :  { %1652 = dma.vmem_to_hbm [thread:$0]  %s1648_s9, 128, %s1650_s18, [#allocation5]  }
 0x632   :  { %2080 = dma.done.wait [#allocation5], 128  }
 0x633   :  { %2081 = vsyncadd [#allocation5], 4294967168 }
 0x634   :  { %2082 = dma.done.wait [#allocation10], 256  }
 0x635   :  { %2083 = vsyncadd [#allocation10], 4294967040 }
 0x636   :  { %1687 = vsyncpa [#allocation4], 1 }
 0x637   :  { %1688 = vsyncpa [#allocation7], 1 }
 0x638   :  { %1689 = vsyncpa [#allocation5], 1 }
 0x639   :  { %1690 = vsyncpa [#allocation10], 1 }

</bundles_post_ra>
